<compile_context>
chip_gen: v7x
topology: tpu7x:2x2x1
jax: 0.10.0
libtpu: 0.0.40
codegen_flags: <defaults>
</compile_context>

<pallas_src>
import math
from functools import partial

import jax
import jax.numpy as jnp
from jax.experimental import pallas as pl
from jax.experimental.pallas import tpu as pltpu


def mhsa_kernel(x_ref, wqkv_ref, bqkv_ref, wo_ref, bo_ref, o_ref, *,
                num_heads, head_dim):
    """One grid step = one batch element. Fused QKV + per-head attention +
    accumulation through the output projection, all in-kernel."""
    S = x_ref.shape[1]
    E = num_heads * head_dim
    x = x_ref[0]                                            # (S, E)

    # Fused QKV projection: single MXU pass with N = 3E (instead of 3x N=E).
    qkv = jnp.dot(x, wqkv_ref[...], preferred_element_type=jnp.float32)
    qkv = qkv + bqkv_ref[...]                               # (S, 3E)

    scale = 1.0 / math.sqrt(head_dim)
    q = qkv[:, 0 * E:1 * E] * scale                         # pre-scale q once
    k = qkv[:, 1 * E:2 * E]
    v = qkv[:, 2 * E:3 * E]

    # Accumulate each head's contribution directly through the output
    # projection: out += softmax(q_h k_h^T) v_h @ Wo[h*hd:(h+1)*hd, :].
    out = jnp.zeros((S, E), jnp.float32)
    for h in range(num_heads):                              # static unroll (small)
        sl = slice(h * head_dim, (h + 1) * head_dim)
        qh, kh, vh = q[:, sl], k[:, sl], v[:, sl]           # (S, hd) each

        scores = jax.lax.dot_general(                       # (S, S), MXU
            qh, kh, (((1,), (1,)), ((), ())),
            preferred_element_type=jnp.float32)

        m = jnp.max(scores, axis=-1, keepdims=True)         # stable softmax
        p = jnp.exp(scores - m)                             # un-normalized probs
        denom = jnp.sum(p, axis=-1, keepdims=True)          # (S, 1)

        ah = jnp.dot(p, vh, preferred_element_type=jnp.float32)   # (S, hd)
        ah = ah * pl.reciprocal(denom, approx=False)        # rescale (S,hd), not (S,S)

        out = out + jnp.dot(ah, wo_ref[sl, :],
                            preferred_element_type=jnp.float32)   # Wo accumulation

    out = out + bo_ref[...]
    o_ref[0] = out.astype(o_ref.dtype)


def multi_head_self_attention(x_nchw, params, num_heads):
    B, C, H, W = x_nchw.shape
    E = C
    S = H * W
    head_dim = E // num_heads
    assert E % num_heads == 0

    # Same raw reshape PyTorch does on the contiguous NCHW tensor.
    x_seq = x_nchw.reshape(B, S, E)

    wq, wk, wv, wo, bq, bk, bv, bo = params
    # Fuse Q/K/V weights and biases in the wrapper (one-time, outside the kernel).
    wqkv = jnp.concatenate([wq, wk, wv], axis=1)            # (E, 3E)
    bqkv = jnp.concatenate([bq, bk, bv], axis=1)            # (1, 3E)

    kernel = partial(mhsa_kernel, num_heads=num_heads, head_dim=head_dim)

    out_seq = pl.pallas_call(
        kernel,
        out_shape=jax.ShapeDtypeStruct((B, S, E), jnp.float32),
        grid=(B,),
        in_specs=[
            pl.BlockSpec((1, S, E), lambda b: (b, 0, 0)),   # x_seq per batch
            pl.BlockSpec((E, 3 * E), lambda b: (0, 0)),     # fused Wqkv (in, out)
            pl.BlockSpec((1, 3 * E), lambda b: (0, 0)),     # fused bqkv
            pl.BlockSpec((E, E), lambda b: (0, 0)),         # Wo
            pl.BlockSpec((1, E), lambda b: (0, 0)),         # bo
        ],
        out_specs=pl.BlockSpec((1, S, E), lambda b: (b, 0, 0)),
        compiler_params=pltpu.CompilerParams(
            dimension_semantics=("parallel",)),             # 2 steps -> both v7x TCs
    )(x_seq, wqkv, bqkv, wo, bo)

    # (B, S, E) -> (B, H, W, E) -> (B, E, H, W), exactly as PyTorch.
    return out_seq.reshape(B, H, W, E).transpose(0, 3, 1, 2)


def init_params(key, embed_size):
    """Deterministic xavier_uniform weights (stored as (in, out) = W.T) + zero biases."""
    E = embed_size
    bound = math.sqrt(6.0 / (E + E))
    keys = jax.random.split(key, 4)
    ws = [jax.random.uniform(k, (E, E), jnp.float32, -bound, bound) for k in keys]
    bs = [jnp.zeros((1, E), jnp.float32) for _ in range(4)]
    return (*ws, *bs)


def reference(x_nchw, params, num_heads):
    """Pure-JAX reference mirroring the PyTorch forward, for verification."""
    B, C, H, W = x_nchw.shape
    E, S, hd = C, H * W, C // num_heads
    wq, wk, wv, wo, bq, bk, bv, bo = params
    x = x_nchw.reshape(B, S, E)

    def split(t):
        return t.reshape(B, S, num_heads, hd).transpose(0, 2, 1, 3)

    q = split(x @ wq + bq)
    k = split(x @ wk + bk)
    v = split(x @ wv + bv)
    scores = jnp.einsum('bhsd,bhtd->bhst', q, k) / math.sqrt(hd)
    p = jax.nn.softmax(scores, axis=-1)
    a = jnp.einsum('bhst,bhtd->bhsd', p, v).transpose(0, 2, 1, 3).reshape(B, S, E)
    o = a @ wo + bo
    return o.reshape(B, H, W, E).transpose(0, 3, 1, 2)


if __name__ == "__main__":
    # embed_size must equal channels (implied by x.reshape(B, H*W, -1)).
    B, C, H, W = 2, 32, 8, 8
    num_heads = 4

    key = jax.random.PRNGKey(0)
    k_x, k_p = jax.random.split(key)
    x = jax.random.normal(k_x, (B, C, H, W), jnp.float32)
    params = init_params(k_p, C)

    out = multi_head_self_attention(x, params, num_heads)
    out = jax.block_until_ready(out)

    ref = reference(x, params, num_heads)
    assert out.shape == (B, C, H, W)
    assert jnp.allclose(out, ref, atol=1e-4, rtol=1e-4), "mismatch vs reference"

    print("KERNEL_OK")
</pallas_src>

<mosaic_0001>
module attributes {stable_mosaic.version = 11 : i64} {
  func.func @mhsa_kernel(%arg0: i32, %arg1: memref<1x64x32xf32, #tpu.memory_space<vmem>>, %arg2: memref<32x96xf32, #tpu.memory_space<vmem>>, %arg3: memref<1x96xf32, #tpu.memory_space<vmem>>, %arg4: memref<32x32xf32, #tpu.memory_space<vmem>>, %arg5: memref<1x32xf32, #tpu.memory_space<vmem>>, %arg6: memref<1x64x32xf32, #tpu.memory_space<vmem>>) attributes {dimension_semantics = [#tpu.dimension_semantics<parallel>], iteration_bounds = array<i64: 2>, scalar_prefetch = 0 : i64, scratch_operands = 0 : i64, tpu.core_type = #tpu.core_type<tc>, window_params = [{transform_indices = @transform_0, window_bounds = array<i64: 1, 64, 32>}, {pipeline_mode = #tpu.pipeline_mode<synchronous>, transform_indices = @transform_1, window_bounds = array<i64: 32, 96>}, {pipeline_mode = #tpu.pipeline_mode<synchronous>, transform_indices = @transform_2, window_bounds = array<i64: 1, 96>}, {pipeline_mode = #tpu.pipeline_mode<synchronous>, transform_indices = @transform_3, window_bounds = array<i64: 32, 32>}, {pipeline_mode = #tpu.pipeline_mode<synchronous>, transform_indices = @transform_4, window_bounds = array<i64: 1, 32>}, {transform_indices = @transform_5, window_bounds = array<i64: 1, 64, 32>}]} {
    %c0 = arith.constant 0 : index
    %c0_0 = arith.constant 0 : index
    %c0_1 = arith.constant 0 : index
    %0 = vector.load %arg1[%c0, %c0_0, %c0_1] : memref<1x64x32xf32, #tpu.memory_space<vmem>>, vector<1x64x32xf32>
    %1 = vector.shape_cast %0 : vector<1x64x32xf32> to vector<64x32xf32>
    %c0_2 = arith.constant 0 : index
    %c0_3 = arith.constant 0 : index
    %2 = vector.load %arg2[%c0_2, %c0_3] : memref<32x96xf32, #tpu.memory_space<vmem>>, vector<32x96xf32>
    %cst = arith.constant dense<0.000000e+00> : vector<64x96xf32>
    %3 = tpu.matmul %1, %2, %cst {dimension_numbers = #tpu.dot_dimension_numbers<[1], [0], [0], [1], [0, 0, 1, 1], [], []>} : vector<64x32xf32>, vector<32x96xf32>, vector<64x96xf32> -> vector<64x96xf32>
    %c0_4 = arith.constant 0 : index
    %c0_5 = arith.constant 0 : index
    %4 = vector.load %arg3[%c0_4, %c0_5] : memref<1x96xf32, #tpu.memory_space<vmem>>, vector<1x96xf32>
    %5 = vector.broadcast %4 : vector<1x96xf32> to vector<64x96xf32>
    %6 = arith.addf %3, %5 : vector<64x96xf32>
    %7 = vector.extract_strided_slice %6 {offsets = [0, 0], sizes = [64, 32], strides = [1, 1]} : vector<64x96xf32> to vector<64x32xf32>
    %cst_6 = arith.constant 0.353553385 : f32
    %8 = vector.broadcast %cst_6 : f32 to vector<64x32xf32>
    %9 = arith.mulf %7, %8 : vector<64x32xf32>
    %10 = vector.extract_strided_slice %6 {offsets = [0, 32], sizes = [64, 32], strides = [1, 1]} : vector<64x96xf32> to vector<64x32xf32>
    %11 = vector.extract_strided_slice %6 {offsets = [0, 64], sizes = [64, 32], strides = [1, 1]} : vector<64x96xf32> to vector<64x32xf32>
    %cst_7 = arith.constant 0.000000e+00 : f32
    %12 = vector.broadcast %cst_7 : f32 to vector<64x32xf32>
    %13 = vector.extract_strided_slice %9 {offsets = [0, 0], sizes = [64, 8], strides = [1, 1]} : vector<64x32xf32> to vector<64x8xf32>
    %14 = vector.extract_strided_slice %10 {offsets = [0, 0], sizes = [64, 8], strides = [1, 1]} : vector<64x32xf32> to vector<64x8xf32>
    %15 = vector.extract_strided_slice %11 {offsets = [0, 0], sizes = [64, 8], strides = [1, 1]} : vector<64x32xf32> to vector<64x8xf32>
    %cst_8 = arith.constant dense<0.000000e+00> : vector<64x64xf32>
    %16 = tpu.matmul %13, %14, %cst_8 {dimension_numbers = #tpu.dot_dimension_numbers<[1], [1], [0], [0], [0, 0, 1, 0], [], []>} : vector<64x8xf32>, vector<64x8xf32>, vector<64x64xf32> -> vector<64x64xf32>
    %cst_9 = arith.constant dense<0xFF800000> : vector<64xf32>
    %17 = vector.multi_reduction <maximumf>, %16, %cst_9 [1] : vector<64x64xf32> to vector<64xf32>
    %18 = vector.shape_cast %17 : vector<64xf32> to vector<64x1xf32>
    %19 = vector.broadcast %18 : vector<64x1xf32> to vector<64x64xf32>
    %20 = arith.subf %16, %19 : vector<64x64xf32>
    %21 = math.exp %20 : vector<64x64xf32>
    %cst_10 = arith.constant dense<0.000000e+00> : vector<64xf32>
    %22 = vector.multi_reduction <add>, %21, %cst_10 [1] : vector<64x64xf32> to vector<64xf32>
    %23 = vector.shape_cast %22 : vector<64xf32> to vector<64x1xf32>
    %cst_11 = arith.constant dense<0.000000e+00> : vector<64x8xf32>
    %24 = tpu.matmul %21, %15, %cst_11 {dimension_numbers = #tpu.dot_dimension_numbers<[1], [0], [0], [1], [0, 0, 1, 1], [], []>} : vector<64x64xf32>, vector<64x8xf32>, vector<64x8xf32> -> vector<64x8xf32>
    %25 = tpu.reciprocal %23 : vector<64x1xf32> -> vector<64x1xf32>
    %26 = vector.broadcast %25 : vector<64x1xf32> to vector<64x8xf32>
    %27 = arith.mulf %24, %26 : vector<64x8xf32>
    %c0_12 = arith.constant 0 : index
    %c0_13 = arith.constant 0 : index
    %28 = vector.load %arg4[%c0_12, %c0_13] : memref<32x32xf32, #tpu.memory_space<vmem>>, vector<8x32xf32>
    %cst_14 = arith.constant dense<0.000000e+00> : vector<64x32xf32>
    %29 = tpu.matmul %27, %28, %cst_14 {dimension_numbers = #tpu.dot_dimension_numbers<[1], [0], [0], [1], [0, 0, 1, 1], [], []>} : vector<64x8xf32>, vector<8x32xf32>, vector<64x32xf32> -> vector<64x32xf32>
    %30 = arith.addf %12, %29 : vector<64x32xf32>
    %31 = vector.extract_strided_slice %9 {offsets = [0, 8], sizes = [64, 8], strides = [1, 1]} : vector<64x32xf32> to vector<64x8xf32>
    %32 = vector.extract_strided_slice %10 {offsets = [0, 8], sizes = [64, 8], strides = [1, 1]} : vector<64x32xf32> to vector<64x8xf32>
    %33 = vector.extract_strided_slice %11 {offsets = [0, 8], sizes = [64, 8], strides = [1, 1]} : vector<64x32xf32> to vector<64x8xf32>
    %cst_15 = arith.constant dense<0.000000e+00> : vector<64x64xf32>
    %34 = tpu.matmul %31, %32, %cst_15 {dimension_numbers = #tpu.dot_dimension_numbers<[1], [1], [0], [0], [0, 0, 1, 0], [], []>} : vector<64x8xf32>, vector<64x8xf32>, vector<64x64xf32> -> vector<64x64xf32>
    %cst_16 = arith.constant dense<0xFF800000> : vector<64xf32>
    %35 = vector.multi_reduction <maximumf>, %34, %cst_16 [1] : vector<64x64xf32> to vector<64xf32>
    %36 = vector.shape_cast %35 : vector<64xf32> to vector<64x1xf32>
    %37 = vector.broadcast %36 : vector<64x1xf32> to vector<64x64xf32>
    %38 = arith.subf %34, %37 : vector<64x64xf32>
    %39 = math.exp %38 : vector<64x64xf32>
    %cst_17 = arith.constant dense<0.000000e+00> : vector<64xf32>
    %40 = vector.multi_reduction <add>, %39, %cst_17 [1] : vector<64x64xf32> to vector<64xf32>
    %41 = vector.shape_cast %40 : vector<64xf32> to vector<64x1xf32>
    %cst_18 = arith.constant dense<0.000000e+00> : vector<64x8xf32>
    %42 = tpu.matmul %39, %33, %cst_18 {dimension_numbers = #tpu.dot_dimension_numbers<[1], [0], [0], [1], [0, 0, 1, 1], [], []>} : vector<64x64xf32>, vector<64x8xf32>, vector<64x8xf32> -> vector<64x8xf32>
    %43 = tpu.reciprocal %41 : vector<64x1xf32> -> vector<64x1xf32>
    %44 = vector.broadcast %43 : vector<64x1xf32> to vector<64x8xf32>
    %45 = arith.mulf %42, %44 : vector<64x8xf32>
    %c8 = arith.constant 8 : index
    %c0_19 = arith.constant 0 : index
    %46 = vector.load %arg4[%c8, %c0_19] : memref<32x32xf32, #tpu.memory_space<vmem>>, vector<8x32xf32>
    %cst_20 = arith.constant dense<0.000000e+00> : vector<64x32xf32>
    %47 = tpu.matmul %45, %46, %cst_20 {dimension_numbers = #tpu.dot_dimension_numbers<[1], [0], [0], [1], [0, 0, 1, 1], [], []>} : vector<64x8xf32>, vector<8x32xf32>, vector<64x32xf32> -> vector<64x32xf32>
    %48 = arith.addf %30, %47 : vector<64x32xf32>
    %49 = vector.extract_strided_slice %9 {offsets = [0, 16], sizes = [64, 8], strides = [1, 1]} : vector<64x32xf32> to vector<64x8xf32>
    %50 = vector.extract_strided_slice %10 {offsets = [0, 16], sizes = [64, 8], strides = [1, 1]} : vector<64x32xf32> to vector<64x8xf32>
    %51 = vector.extract_strided_slice %11 {offsets = [0, 16], sizes = [64, 8], strides = [1, 1]} : vector<64x32xf32> to vector<64x8xf32>
    %cst_21 = arith.constant dense<0.000000e+00> : vector<64x64xf32>
    %52 = tpu.matmul %49, %50, %cst_21 {dimension_numbers = #tpu.dot_dimension_numbers<[1], [1], [0], [0], [0, 0, 1, 0], [], []>} : vector<64x8xf32>, vector<64x8xf32>, vector<64x64xf32> -> vector<64x64xf32>
    %cst_22 = arith.constant dense<0xFF800000> : vector<64xf32>
    %53 = vector.multi_reduction <maximumf>, %52, %cst_22 [1] : vector<64x64xf32> to vector<64xf32>
    %54 = vector.shape_cast %53 : vector<64xf32> to vector<64x1xf32>
    %55 = vector.broadcast %54 : vector<64x1xf32> to vector<64x64xf32>
    %56 = arith.subf %52, %55 : vector<64x64xf32>
    %57 = math.exp %56 : vector<64x64xf32>
    %cst_23 = arith.constant dense<0.000000e+00> : vector<64xf32>
    %58 = vector.multi_reduction <add>, %57, %cst_23 [1] : vector<64x64xf32> to vector<64xf32>
    %59 = vector.shape_cast %58 : vector<64xf32> to vector<64x1xf32>
    %cst_24 = arith.constant dense<0.000000e+00> : vector<64x8xf32>
    %60 = tpu.matmul %57, %51, %cst_24 {dimension_numbers = #tpu.dot_dimension_numbers<[1], [0], [0], [1], [0, 0, 1, 1], [], []>} : vector<64x64xf32>, vector<64x8xf32>, vector<64x8xf32> -> vector<64x8xf32>
    %61 = tpu.reciprocal %59 : vector<64x1xf32> -> vector<64x1xf32>
    %62 = vector.broadcast %61 : vector<64x1xf32> to vector<64x8xf32>
    %63 = arith.mulf %60, %62 : vector<64x8xf32>
    %c16 = arith.constant 16 : index
    %c0_25 = arith.constant 0 : index
    %64 = vector.load %arg4[%c16, %c0_25] : memref<32x32xf32, #tpu.memory_space<vmem>>, vector<8x32xf32>
    %cst_26 = arith.constant dense<0.000000e+00> : vector<64x32xf32>
    %65 = tpu.matmul %63, %64, %cst_26 {dimension_numbers = #tpu.dot_dimension_numbers<[1], [0], [0], [1], [0, 0, 1, 1], [], []>} : vector<64x8xf32>, vector<8x32xf32>, vector<64x32xf32> -> vector<64x32xf32>
    %66 = arith.addf %48, %65 : vector<64x32xf32>
    %67 = vector.extract_strided_slice %9 {offsets = [0, 24], sizes = [64, 8], strides = [1, 1]} : vector<64x32xf32> to vector<64x8xf32>
    %68 = vector.extract_strided_slice %10 {offsets = [0, 24], sizes = [64, 8], strides = [1, 1]} : vector<64x32xf32> to vector<64x8xf32>
    %69 = vector.extract_strided_slice %11 {offsets = [0, 24], sizes = [64, 8], strides = [1, 1]} : vector<64x32xf32> to vector<64x8xf32>
    %cst_27 = arith.constant dense<0.000000e+00> : vector<64x64xf32>
    %70 = tpu.matmul %67, %68, %cst_27 {dimension_numbers = #tpu.dot_dimension_numbers<[1], [1], [0], [0], [0, 0, 1, 0], [], []>} : vector<64x8xf32>, vector<64x8xf32>, vector<64x64xf32> -> vector<64x64xf32>
    %cst_28 = arith.constant dense<0xFF800000> : vector<64xf32>
    %71 = vector.multi_reduction <maximumf>, %70, %cst_28 [1] : vector<64x64xf32> to vector<64xf32>
    %72 = vector.shape_cast %71 : vector<64xf32> to vector<64x1xf32>
    %73 = vector.broadcast %72 : vector<64x1xf32> to vector<64x64xf32>
    %74 = arith.subf %70, %73 : vector<64x64xf32>
    %75 = math.exp %74 : vector<64x64xf32>
    %cst_29 = arith.constant dense<0.000000e+00> : vector<64xf32>
    %76 = vector.multi_reduction <add>, %75, %cst_29 [1] : vector<64x64xf32> to vector<64xf32>
    %77 = vector.shape_cast %76 : vector<64xf32> to vector<64x1xf32>
    %cst_30 = arith.constant dense<0.000000e+00> : vector<64x8xf32>
    %78 = tpu.matmul %75, %69, %cst_30 {dimension_numbers = #tpu.dot_dimension_numbers<[1], [0], [0], [1], [0, 0, 1, 1], [], []>} : vector<64x64xf32>, vector<64x8xf32>, vector<64x8xf32> -> vector<64x8xf32>
    %79 = tpu.reciprocal %77 : vector<64x1xf32> -> vector<64x1xf32>
    %80 = vector.broadcast %79 : vector<64x1xf32> to vector<64x8xf32>
    %81 = arith.mulf %78, %80 : vector<64x8xf32>
    %c24 = arith.constant 24 : index
    %c0_31 = arith.constant 0 : index
    %82 = vector.load %arg4[%c24, %c0_31] : memref<32x32xf32, #tpu.memory_space<vmem>>, vector<8x32xf32>
    %cst_32 = arith.constant dense<0.000000e+00> : vector<64x32xf32>
    %83 = tpu.matmul %81, %82, %cst_32 {dimension_numbers = #tpu.dot_dimension_numbers<[1], [0], [0], [1], [0, 0, 1, 1], [], []>} : vector<64x8xf32>, vector<8x32xf32>, vector<64x32xf32> -> vector<64x32xf32>
    %84 = arith.addf %66, %83 : vector<64x32xf32>
    %c0_33 = arith.constant 0 : index
    %c0_34 = arith.constant 0 : index
    %85 = vector.load %arg5[%c0_33, %c0_34] : memref<1x32xf32, #tpu.memory_space<vmem>>, vector<1x32xf32>
    %86 = vector.broadcast %85 : vector<1x32xf32> to vector<64x32xf32>
    %87 = arith.addf %84, %86 : vector<64x32xf32>
    %c0_35 = arith.constant 0 : index
    %c0_36 = arith.constant 0 : index
    %c0_37 = arith.constant 0 : index
    %88 = vector.load %arg6[%c0_35, %c0_36, %c0_37] : memref<1x64x32xf32, #tpu.memory_space<vmem>>, vector<1x64x32xf32>
    %89 = vector.shape_cast %88 : vector<1x64x32xf32> to vector<64x32xf32>
    %90 = vector.shape_cast %87 : vector<64x32xf32> to vector<1x64x32xf32>
    tpu.vector_store %arg6[%c0_35, %c0_36, %c0_37], %90 {strides = array<i32>} : memref<1x64x32xf32, #tpu.memory_space<vmem>>, vector<1x64x32xf32>,
    return
  }
  func.func @transform_0(%arg0: i32) -> (i32, i32, i32) {
    %c0_i32 = arith.constant 0 : i32
    %c0_i32_0 = arith.constant 0 : i32
    %c0_i32_1 = arith.constant 0 : i32
    return %arg0, %c0_i32, %c0_i32_0 : i32, i32, i32
  }
  func.func @transform_1(%arg0: i32) -> (i32, i32) {
    %c0_i32 = arith.constant 0 : i32
    %c0_i32_0 = arith.constant 0 : i32
    %c0_i32_1 = arith.constant 0 : i32
    return %c0_i32, %c0_i32_0 : i32, i32
  }
  func.func @transform_2(%arg0: i32) -> (i32, i32) {
    %c0_i32 = arith.constant 0 : i32
    %c0_i32_0 = arith.constant 0 : i32
    %c0_i32_1 = arith.constant 0 : i32
    return %c0_i32, %c0_i32_0 : i32, i32
  }
  func.func @transform_3(%arg0: i32) -> (i32, i32) {
    %c0_i32 = arith.constant 0 : i32
    %c0_i32_0 = arith.constant 0 : i32
    %c0_i32_1 = arith.constant 0 : i32
    return %c0_i32, %c0_i32_0 : i32, i32
  }
  func.func @transform_4(%arg0: i32) -> (i32, i32) {
    %c0_i32 = arith.constant 0 : i32
    %c0_i32_0 = arith.constant 0 : i32
    %c0_i32_1 = arith.constant 0 : i32
    return %c0_i32, %c0_i32_0 : i32, i32
  }
  func.func @transform_5(%arg0: i32) -> (i32, i32, i32) {
    %c0_i32 = arith.constant 0 : i32
    %c0_i32_0 = arith.constant 0 : i32
    %c0_i32_1 = arith.constant 0 : i32
    return %arg0, %c0_i32, %c0_i32_0 : i32, i32, i32
  }
}

</mosaic_0001>

<bundles_post_ra>
// kernel: tpu_custom_call.1
= control target key start
LH: loop header
LB: loop body
LE: loop exit
PB: predicated region body
PF: predicated region fallthrough
CT: control target
= control target key end

     0   :  { %s3821_s18 = smov 0   ;;  %s4499_s0 = inlined_call_operand.vmem [shape: f32[2,64,32], index: 0, kind: input, shape index: {}]   ;;  %s4500_s1 = inlined_call_operand.vmem [shape: f32[32,96], index: 1, kind: input, shape index: {}]   ;;  %s4501_s2 = inlined_call_operand.vmem [shape: f32[1,96], index: 2, kind: input, shape index: {}]   ;;  %s4502_s3 = inlined_call_operand.vmem [shape: f32[32,32], index: 3, kind: input, shape index: {}]   ;;  %s4503_s4 = inlined_call_operand.vmem [shape: f32[1,32], index: 4, kind: input, shape index: {}]   ;;  %s4504_s5 = inlined_call_operand.vmem [shape: f32[2,64,32], index: 5, kind: output, shape index: {}]  }
   0x1 LB: > { %s2638_s19 = sadd.s32 4294967295, %s3778_s18   ;;  %p2642_p0 = scmp.ge.s32.totalorder %s3778_s18, 1  ;;  %s3778_s18 = sphi %s3821_s18, %s15_s18  }
   0x2   : > { %p187_p1 = scmp.lt.s32.totalorder %s3778_s18, 3 }
   0x4   : > { %p188_p2 = pnand %p2642_p0, %p187_p1 }
   0x5   : > { %v233_v0 = vld [vmem:[%s4500_s1] sm:$0xff] (!%p188_p2)  ;;  %v234_v1 = vld [vmem:[%s4500_s1 + $0x8] sm:$0xff] (!%p188_p2)  ;;  %v235_v2 = vld [vmem:[%s4500_s1 + $0x10] sm:$0xff] (!%p188_p2)  ;;  %p215_p3 = scmp.lt.s32.totalorder (!%p188_p2), %s2638_s19, 1  ;;  %vm244_vm0 = vcmask (!%p188_p2), 261120   ;;  %vm406_vm1 = vcmask (!%p188_p2), 64512  }
   0x6   : > { %191 = sbr.rel (%p188_p2) target bundleno = 2129 (0x851), region = 40  ;;  %v3265_v3 = vpack.c.bf16 (!%p188_p2), %v234_v1, %v233_v0  ;;  %v236_v4 = vld [vmem:[%s4500_s1 + $0x18] sm:$0xff] (!%p188_p2)  ;;  %v2647_v14 = vld [vmem:[%s4501_s2] ss:$0 sm:$0xff] (!%p188_p2)  ;;  %s3780_s9 = smov (!%p188_p2), 96   ;;  %vm3907_vm2 = vmpackc.low (!%p188_p2), %vm406_vm1, %vm406_vm1  ;;  %vm552_vm3 = vcmask (!%p188_p2), 523264  }
   0x7   : > { %v3269_v5 = vpack.c.bf16 (!%p188_p2), %v236_v4, %v235_v2  ;;  %s3781_s10 = smov (!%p188_p2), 64   ;;  %s3782_s11 = smov (!%p188_p2), 88  }
   0x8   : > { %3266 = vmatprep.subr.bf16.mxu0 (!%p188_p2), %v3265_v3  ;;  %s3783_s12 = smov (!%p188_p2), 120   ;;  %s3784_s13 = smov (!%p188_p2), 80  }
   0x9   : > { %3268 = vmatpush3.bf16.msra.mxu0 (!%p188_p2), %v3265_v3  ;;  %s3785_s14 = smov (!%p188_p2), 112   ;;  %s3786_s15 = smov (!%p188_p2), 56  }
   0xa   : > { %3270 = vmatprep.subr.bf16.mxu0 (!%p188_p2), %v3269_v5  ;;  %s3787_s16 = smov (!%p188_p2), 72   ;;  %s3788_s17 = smov (!%p188_p2), 104  }
   0xb   : > { %s3789_s20 = smov (!%p188_p2), 48   ;;  %s3790_s27 = smov (!%p188_p2), 40  }
   0xd   : > { %s4508_s19 = smov (!%p215_p3, %s2638_s19), 1  ;;  %3272 = vmatpush3.bf16.msra.mxu0 %v3269_v5 }
   0xe   : > { %s2787_s28 = sshll.u32 %s4508_s19, 6 }
   0xf   : > { %s219_s6 = scalar_lea.vmem %s4499_s0, %s2787_s28 }
  0x10   : > { %v225_v6 = vld [vmem:[%s219_s6] sm:$0xff]  ;;  %v226_v7 = vld [vmem:[%s219_s6 + $0x8] sm:$0xff]  ;;  %v227_v8 = vld [vmem:[%s219_s6 + $0x10] sm:$0xff] }
  0x11   : > { %2973 = vmatprep.mubr.msk.f32.mxu0 %vm244_vm0, %v225_v6  ;;  %v228_v9 = vld [vmem:[%s219_s6 + $0x18] sm:$0xff]  ;;  %v229_v10 = vld [vmem:[%s219_s6 + $0x20] sm:$0xff]  ;;  %v230_v11 = vld [vmem:[%s219_s6 + $0x28] sm:$0xff] }
  0x12   : > { %2974 = vmatmul.mubr.msk.f32.vlgmr.msra.gmra.mrb[0].mxu0 %vm244_vm0, %v226_v7  ;;  %v231_v12 = vld [vmem:[%s219_s6 + $0x30] sm:$0xff]  ;;  %v232_v13 = vld [vmem:[%s219_s6 + $0x38] sm:$0xff] }
  0x13   : > { %2976 = vmatprep.mubr.msk.f32.mxu0 %vm244_vm0, %v227_v8 }
  0x16   : > { %2977 = vmatmul.mubr.msk.f32.gmra.mrb[2].mxu0 %vm244_vm0, %v228_v9 }
  0x17   : > { %2979 = vmatprep.mubr.msk.f32.mxu0 %vm244_vm0, %v229_v10 }
  0x1a   : > { %2980 = vmatmul.mubr.msk.f32.gmra.mrb[4].mxu0 %vm244_vm0, %v230_v11 }
  0x1b   : > { %2982 = vmatprep.mubr.msk.f32.mxu0 %vm244_vm0, %v231_v12 }
  0x1e   : > { %2983 = vmatmul.mubr.msk.f32.gmra.mrb[6].mxu0 %vm244_vm0, %v232_v13 }
  0xe5   : > { %v2975_v15 = vpop.f32.mrb[0].mxu0 }
  0xe6   : > { %v3860_v16 = vadd.f32 %v2975_v15, %v2647_v14  ;;  %v335_v17 = vpop.f32.mrb[1].mxu0 }
  0xe7   : > { %v336_v18 = vadd.f32 %v2647_v14, %v335_v17 }
  0xe8   : > { %v3935_v10 = vmul.f32 0.35355338, %v3860_v16 }
  0xe9   : > { %v2978_v19 = vpop.f32.mrb[2].mxu0  ;;  %v3863_v20 = vpack.i.bf16 %v3860_v16, %v336_v18  ;;  %v3865_v21 = vmul.f32 0.35355338, %v336_v18 }
  0xea   : > { %v3867_v22 = vadd.f32 %v2978_v19, %v2647_v14  ;;  %v345_v23 = vpop.f32.mrb[3].mxu0 }
  0xeb   : > { %v3869_v24 = vadd.f32 %v2647_v14, %v345_v23  ;;  %3485 = vrot.lane.b32.xlu0 %v3863_v20, %s3780_s9  ;;  %3001 = vmatprep.mubr.msk.f32.mxu1 %vm406_vm1, %v3865_v21 }
  0xec   : > { %v3945_v12 = vmul.f32 0.35355338, %v3867_v22 }
  0xed   : > { %v2981_v25 = vpop.f32.mrb[4].mxu0  ;;  %v3876_v26 = vpack.i.bf16 %v3867_v22, %v3869_v24  ;;  %v3938_v11 = vmul.f32 0.35355338, %v3869_v24 }
  0xee   : > { %v3878_v27 = vadd.f32 %v2981_v25, %v2647_v14  ;;  %v355_v28 = vpop.f32.mrb[5].mxu0 }
  0xef   : > { %v3880_v29 = vadd.f32 %v2647_v14, %v355_v28  ;;  %3490 = vrot.lane.b32.xlu0 %v3876_v26, %s3780_s9 }
  0xf1   : > { %v2984_v30 = vpop.f32.mrb[6].mxu0  ;;  %v3885_v31 = vpack.i.bf16 %v3878_v27, %v3880_v29  ;;  %v3948_v13 = vmul.f32 0.35355338, %v3880_v29 }
  0xf2   : > { %v3887_v32 = vadd.f32 %v2984_v30, %v2647_v14  ;;  %v365_v33 = vpop.f32.mrb[7].mxu0 }
  0xf3   : > { %v3889_v34 = vadd.f32 %v2647_v14, %v365_v33  ;;  %3495 = vrot.lane.b32.xlu1 %v3885_v31, %s3780_s9  ;;  %3505 = vrot.lane.b32.xlu0 %v3863_v20, %s3781_s10  ;;  %v3955_v14 = vmul.f32 0.35355338, %v3878_v27 }
  0xf4   : > { %v3965_v16 = vmul.f32 0.35355338, %v3887_v32 }
  0xf5   : > { %v3895_v35 = vpack.i.bf16 %v3887_v32, %v3889_v34  ;;  %v3958_v15 = vmul.f32 0.35355338, %v3889_v34 }
  0xf7   : > { %3500 = vrot.lane.b32.xlu1 %v3895_v35, %s3780_s9  ;;  %3515 = vrot.lane.b32.xlu0 %v3885_v31, %s3781_s10 }
  0xfb   : > { %3510 = vrot.lane.b32.xlu1 %v3876_v26, %s3781_s10  ;;  %3520 = vrot.lane.b32.xlu0 %v3863_v20, %s3782_s11 }
  0xff   : > { %3525 = vrot.lane.b32.xlu1 %v3876_v26, %s3782_s11 }
 0x103   : > { %3530 = vrot.lane.b32.xlu1 %v3895_v35, %s3781_s10  ;;  %s224_s10 = scalar_lea.vmem %s4504_s5, %s2787_s28 }
 0x15d   : > { %v3486_v36 = vpop.permute.xlu0 %3485 }
 0x15e   : > { %v3488_v37 = vunpack.i.h.bf16 %v3486_v36  ;;  %v3487_v38 = vunpack.i.l.bf16 %v3486_v36 }
 0x160   : > { %v3273_v40 = vpack.c.bf16 %v3488_v37, %v3487_v38 }
 0x161   : > { %v3491_v41 = vpop.permute.xlu0 %3490 }
 0x162   : > { %v3493_v42 = vunpack.i.h.bf16 %v3491_v41  ;;  %v3492_v43 = vunpack.i.l.bf16 %v3491_v41  ;;  %3275 = vmatprep.subr.msk.bf16.mxu1 %vm3907_vm2, %v3273_v40 }
 0x163   : > { %3278 = vmatpush3.bf16.xpose.msk.msra.mxu1 %vm3907_vm2, %v3273_v40 }
 0x164   : > { %v3279_v44 = vpack.c.bf16 %v3493_v42, %v3492_v43 }
 0x165   : > { %v3496_v45 = vpop.permute.xlu1 %3495  ;;  %v3506_v46 = vpop.permute.xlu0 %3505 }
 0x166   : > { %v3498_v47 = vunpack.i.h.bf16 %v3496_v45  ;;  %v3497_v48 = vunpack.i.l.bf16 %v3496_v45  ;;  %v3508_v49 = vunpack.i.h.bf16 %v3506_v46  ;;  %v3507_v50 = vunpack.i.l.bf16 %v3506_v46  ;;  %3281 = vmatprep.subr.msk.bf16.mxu1 %vm3907_vm2, %v3279_v44 }
 0x168   : > { %v3285_v51 = vpack.c.bf16 %v3498_v47, %v3497_v48  ;;  %v3297_v52 = vpack.c.bf16 %v3508_v49, %v3507_v50 }
 0x169   : > { %v3501_v53 = vpop.permute.xlu1 %3500  ;;  %v3516_v56 = vpop.permute.xlu0 %3515 }
 0x16a   : > { %3298 = vmatprep.subr.bf16.mxu0 %v3297_v52  ;;  %v3503_v54 = vunpack.i.h.bf16 %v3501_v53  ;;  %v3502_v55 = vunpack.i.l.bf16 %v3501_v53  ;;  %v3518_v58 = vunpack.i.h.bf16 %v3516_v56  ;;  %v3517_v59 = vunpack.i.l.bf16 %v3516_v56 }
 0x16b   : > { %3284 = vmatpush3.bf16.xpose.msk.msra.mxu1 %vm3907_vm2, %v3279_v44  ;;  %3300 = vmatpush3.bf16.msra.mxu0 %v3297_v52 }
 0x16c   : > { %3287 = vmatprep.subr.msk.bf16.mxu1 %vm3907_vm2, %v3285_v51  ;;  %v3291_v62 = vpack.c.bf16 %v3503_v54, %v3502_v55  ;;  %v3305_v1 = vpack.c.bf16 %v3518_v58, %v3517_v59 }
 0x16d   : > { %v3511_v57 = vpop.permute.xlu1 %3510  ;;  %v3521_v2 = vpop.permute.xlu0 %3520 }
 0x16e   : > { %v3513_v60 = vunpack.i.h.bf16 %v3511_v57  ;;  %v3512_v61 = vunpack.i.l.bf16 %v3511_v57  ;;  %v3523_v4 = vunpack.i.h.bf16 %v3521_v2  ;;  %v3522_v5 = vunpack.i.l.bf16 %v3521_v2 }
 0x170   : > { %v3301_v63 = vpack.c.bf16 %v3513_v60, %v3512_v61  ;;  %v3927_v9 = vpack.c.bf16 %v3523_v4, %v3522_v5 }
 0x171   : > { %v3921_v0 = vpop.permute.xlu1 %3525 }
 0x172   : > { %3302 = vmatprep.subr.bf16.mxu0 %v3301_v63  ;;  %v3528_v54 = vunpack.i.h.bf16 %v3921_v0  ;;  %v3527_v55 = vunpack.i.l.bf16 %v3921_v0 }
 0x173   : > { %3290 = vmatpush3.bf16.xpose.msk.msra.mxu1 %vm3907_vm2, %v3285_v51  ;;  %3304 = vmatpush3.bf16.msra.mxu0 %v3301_v63 }
 0x174   : > { %3306 = vmatprep.subr.bf16.mxu0 %v3305_v1  ;;  %3293 = vmatprep.subr.msk.bf16.mxu1 %vm3907_vm2, %v3291_v62 }
 0x175   : > { %v3531_v3 = vpop.permute.xlu1 %3530 }
 0x176   : > { %v3533_v6 = vunpack.i.h.bf16 %v3531_v3  ;;  %v3532_v7 = vunpack.i.l.bf16 %v3531_v3 }
 0x177   : > { %3308 = vmatpush3.bf16.msra.mxu0 %v3305_v1 }
 0x178   : > { %v3309_v8 = vpack.c.bf16 %v3533_v6, %v3532_v7 }
 0x17a   : > { %3310 = vmatprep.subr.bf16.mxu0 %v3309_v8 }
 0x17b   : > { %3296 = vmatpush3.bf16.xpose.msk.msra.mxu1 %vm3907_vm2, %v3291_v62  ;;  %3312 = vmatpush3.bf16.msra.mxu0 %v3309_v8  ;;  %v3319_v62 = vpack.c.bf16 %v3528_v54, %v3527_v55 }
 0x17c   : > { %3315 = vmatprep.subr.msk.bf16.mxu0 %vm3907_vm2, %v3927_v9 }
 0x182   : > { %3002 = vmatmul.mubr.msk.f32.vlgmr.msra.gmra.mrb[0].mxu1 %vm406_vm1, %v3935_v10 }
 0x183   : > { %3004 = vmatprep.mubr.msk.f32.mxu1 %vm406_vm1, %v3938_v11 }
 0x186   : > { %3005 = vmatmul.mubr.msk.f32.gmra.mrb[2].mxu1 %vm406_vm1, %v3945_v12 }
 0x187   : > { %3007 = vmatprep.mubr.msk.f32.mxu1 %vm406_vm1, %v3948_v13 }
 0x18a   : > { %3008 = vmatmul.mubr.msk.f32.gmra.mrb[4].mxu1 %vm406_vm1, %v3955_v14 }
 0x18b   : > { %3010 = vmatprep.mubr.msk.f32.mxu1 %vm406_vm1, %v3958_v15 }
 0x18e   : > { %3011 = vmatmul.mubr.msk.f32.gmra.mrb[6].mxu1 %vm406_vm1, %v3965_v16 }
 0x255   : > { %v3003_v17 = vpop.f32.mrb[0].mxu1 }
 0x256   : > { %v513_v18 = vpop.f32.mrb[1].mxu1  ;;  %v556_v19 = vsel %vm552_vm3, %v3003_v17, -inf }
 0x257   : > { %557 = vmax.xlane.f32.xlu1 %v556_v19  ;;  %v553_v22 = vsel %vm552_vm3, %v513_v18, -inf }
 0x258   : > { %554 = vmax.xlane.f32.xlu0 %v553_v22 }
 0x259   : > { %v3006_v23 = vpop.f32.mrb[2].mxu1 }
 0x25a   : > { %v523_v24 = vpop.f32.mrb[3].mxu1  ;;  %v562_v25 = vsel %vm552_vm3, %v3006_v23, -inf }
 0x25b   : > { %563 = vmax.xlane.f32.xlu1 %v562_v25  ;;  %v559_v27 = vsel %vm552_vm3, %v523_v24, -inf }
 0x25c   : > { %560 = vmax.xlane.f32.xlu0 %v559_v27 }
 0x25d   : > { %v3009_v28 = vpop.f32.mrb[4].mxu1 }
 0x25e   : > { %v3973_v29 = vpop.f32.mrb[5].mxu1  ;;  %v568_v30 = vsel %vm552_vm3, %v3009_v28, -inf }
 0x25f   : > { %v565_v34 = vsel %vm552_vm3, %v3973_v29, -inf }
 0x260   : > { %569 = vmax.xlane.f32.xlu0 %v568_v30 }
 0x261   : > { %v3976_v32 = vpop.f32.mrb[6].mxu1 }
 0x262   : > { %v3978_v33 = vpop.f32.mrb[7].mxu1  ;;  %v574_v36 = vsel %vm552_vm3, %v3976_v32, -inf }
 0x263   : > { %v571_v37 = vsel %vm552_vm3, %v3978_v33, -inf }
 0x264   : > { %566 = vmax.xlane.f32.xlu0 %v565_v34 }
 0x26c   : > { %3540 = vrot.lane.b32.xlu1 %v3895_v35, %s3782_s11 }
 0x27a   : > { %3535 = vrot.lane.b32.xlu0 %v3885_v31, %s3782_s11 }
 0x27e   : > { %795 = vrot.lane.b32.xlu0 %v3865_v21, %s3783_s12 }
 0x282   : > { %799 = vrot.lane.b32.xlu0 %v3938_v11, %s3783_s12 }
 0x286   : > { %803 = vrot.lane.b32.xlu0 %v3948_v13, %s3783_s12 }
 0x28a   : > { %807 = vrot.lane.b32.xlu0 %v3958_v15, %s3783_s12 }
 0x28e   : > { %3545 = vrot.lane.b32.xlu0 %v3863_v20, %s3784_s13 }
 0x290   : > { %575 = vmax.xlane.f32.xlu1 %v574_v36 }
 0x292   : > { %3555 = vrot.lane.b32.xlu0 %v3885_v31, %s3784_s13 }
 0x294   : > { %572 = vmax.xlane.f32.xlu1 %v571_v37 }
 0x296   : > { %1464 = vrot.lane.b32.xlu0 %v3865_v21, %s3785_s14 }
 0x29a   : > { %1468 = vrot.lane.b32.xlu0 %v3938_v11, %s3785_s14 }
 0x29e   : > { %1472 = vrot.lane.b32.xlu0 %v3948_v13, %s3785_s14 }
 0x2a2   : > { %1476 = vrot.lane.b32.xlu0 %v3958_v15, %s3785_s14 }
 0x2a5   : > { %797 = vrot.lane.b32.xlu1 %v3935_v10, %s3783_s12 }
 0x2a6   : > { %3565 = vrot.lane.b32.xlu0 %v3863_v20, %s3786_s15 }
 0x2a9   : > { %801 = vrot.lane.b32.xlu1 %v3945_v12, %s3783_s12 }
 0x2ad   : > { %805 = vrot.lane.b32.xlu1 %v3955_v14, %s3783_s12 }
 0x2b1   : > { %809 = vrot.lane.b32.xlu1 %v3965_v16, %s3783_s12 }
 0x2b5   : > { %3550 = vrot.lane.b32.xlu1 %v3876_v26, %s3784_s13 }
 0x2b9   : > { %3560 = vrot.lane.b32.xlu1 %v3895_v35, %s3784_s13 }
 0x2bd   : > { %1466 = vrot.lane.b32.xlu1 %v3935_v10, %s3785_s14 }
 0x2c1   : > { %1470 = vrot.lane.b32.xlu1 %v3945_v12, %s3785_s14 }
 0x2c5   : > { %1474 = vrot.lane.b32.xlu1 %v3955_v14, %s3785_s14 }
 0x2c9   : > { %1478 = vrot.lane.b32.xlu1 %v3965_v16, %s3785_s14 }
 0x2cd   : > { %3570 = vrot.lane.b32.xlu1 %v3876_v26, %s3786_s15 }
 0x2e4   : > { %v558_v38 = vpop.xlane.xlu1 %557 }
 0x2e5   : > { %v578_v40 = vsub.f32 %v3003_v17, %v558_v38  ;;  %v555_v41 = vpop.xlane.xlu0 %554 }
 0x2e6   : > { %v577_v42 = vsub.f32 %v513_v18, %v555_v41 }
 0x2e7   : > { %v587_v43 = vmul.f32 1.442695, %v578_v40 }
 0x2e8   : > { %v585_v44 = vmul.f32 1.442695, %v577_v42  ;;  %v564_v45 = vpop.xlane.xlu1 %563 }
 0x2e9   : > { %v580_v46 = vsub.f32 %v3006_v23, %v564_v45  ;;  %v561_v47 = vpop.xlane.xlu0 %560 }
 0x2ea   : > { %3644 = vpow2.f32 %v585_v44  ;;  %v579_v48 = vsub.f32 %v523_v24, %v561_v47 }
 0x2eb   : > { %3646 = vpow2.f32 %v587_v43  ;;  %v591_v49 = vmul.f32 1.442695, %v580_v46 }
 0x2ec   : > { %v589_v50 = vmul.f32 1.442695, %v579_v48  ;;  %v3541_v6 = vpop.permute.xlu1 %3540 }
 0x2ed   : > { %v570_v51 = vpop.xlane.xlu0 %569  ;;  %v3543_v17 = vunpack.i.h.bf16 %v3541_v6  ;;  %v3542_v18 = vunpack.i.l.bf16 %v3541_v6 }
 0x2ee   : > { %3648 = vpow2.f32 %v589_v50  ;;  %v582_v52 = vsub.f32 %v3009_v28, %v570_v51 }
 0x2ef   : > { %3650 = vpow2.f32 %v591_v49  ;;  %v3331_v22 = vpack.c.bf16 %v3543_v17, %v3542_v18 }
 0x2f0   : > { %v595_v57 = vmul.f32 1.442695, %v582_v52 }
 0x2f1   : > { %v567_v53 = vpop.xlane.xlu0 %566 }
 0x2f2   : > { %v581_v56 = vsub.f32 %v3973_v29, %v567_v53 }
 0x2f4   : > { %v4017_v58 = vpop.eup %3644  ;;  %v593_v59 = vmul.f32 1.442695, %v581_v56 }
 0x2f5   : > { %v4019_v60 = vpop.eup %3646  ;;  %3029 = vmatprep.mubr.msk.f32.mxu0 %vm552_vm3, %v4017_v58  ;;  %v3536_v61 = vpop.permute.xlu0 %3535 }
 0x2f6   : > { %3652 = vpow2.f32 %v593_v59  ;;  %3030 = vmatmul.mubr.msk.f32.vlgmr.msra.gmra.mrb[8].mxu0 %vm552_vm3, %v4019_v60  ;;  %v3538_v2 = vunpack.i.h.bf16 %v3536_v61  ;;  %v3537_v3 = vunpack.i.l.bf16 %v3536_v61 }
 0x2f7   : > { %3654 = vpow2.f32 %v595_v57  ;;  %3318 = vmatpush3.bf16.xpose.msk.msra.mxu0 %vm3907_vm2, %v3927_v9 }
 0x2f8   : > { %v4028_v63 = vpop.eup %3648  ;;  %3321 = vmatprep.subr.msk.bf16.mxu0 %vm3907_vm2, %v3319_v62  ;;  %v3325_v5 = vpack.c.bf16 %v3538_v2, %v3537_v3 }
 0x2f9   : > { %v4032_v0 = vpop.eup %3650  ;;  %3032 = vmatprep.mubr.msk.f32.mxu0 %vm552_vm3, %v4028_v63  ;;  %v796_v1 = vpop.permute.xlu0 %795 }
 0x2fa   : > { %3033 = vmatmul.mubr.msk.f32.gmra.mrb[10].mxu0 %vm552_vm3, %v4032_v0 }
 0x2fd   : > { %v800_v4 = vpop.permute.xlu0 %799 }
 0x2ff   : > { %3324 = vmatpush3.bf16.xpose.msk.msra.mxu0 %vm3907_vm2, %v3319_v62 }
 0x300   : > { %v4040_v7 = vpop.eup %3652  ;;  %3327 = vmatprep.subr.msk.bf16.mxu0 %vm3907_vm2, %v3325_v5 }
 0x301   : > { %v4044_v8 = vpop.eup %3654  ;;  %3035 = vmatprep.mubr.msk.f32.mxu0 %vm552_vm3, %v4040_v7  ;;  %v804_v9 = vpop.permute.xlu0 %803 }
 0x302   : > { %3036 = vmatmul.mubr.msk.f32.gmra.mrb[12].mxu0 %vm552_vm3, %v4044_v8 }
 0x305   : > { %v808_v19 = vpop.permute.xlu0 %807 }
 0x307   : > { %3330 = vmatpush3.bf16.xpose.msk.msra.mxu0 %vm3907_vm2, %v3325_v5 }
 0x308   : > { %3333 = vmatprep.subr.msk.bf16.mxu0 %vm3907_vm2, %v3331_v22 }
 0x309   : > { %v3546_v23 = vpop.permute.xlu0 %3545 }
 0x30a   : > { %v3548_v24 = vunpack.i.h.bf16 %v3546_v23  ;;  %v3547_v25 = vunpack.i.l.bf16 %v3546_v23 }
 0x30c   : > { %v3353_v27 = vpack.c.bf16 %v3548_v24, %v3547_v25 }
 0x30d   : > { %v3556_v28 = vpop.permute.xlu0 %3555 }
 0x30e   : > { %v3558_v57 = vunpack.i.h.bf16 %v3556_v28  ;;  %v3557_v59 = vunpack.i.l.bf16 %v3556_v28 }
 0x30f   : > { %3336 = vmatpush3.bf16.xpose.msk.msra.mxu0 %vm3907_vm2, %v3331_v22 }
 0x310   : > { %3355 = vmatprep.subr.msk.bf16.mxu0 %vm3907_vm2, %v3353_v27  ;;  %v3365_v62 = vpack.c.bf16 %v3558_v57, %v3557_v59 }
 0x311   : > { %v1465_v29 = vpop.permute.xlu0 %1464 }
 0x315   : > { %v4058_v30 = vpop.permute.xlu0 %1468 }
 0x319   : > { %v4060_v34 = vpop.permute.xlu0 %1472 }
 0x31d   : > { %v4062_v36 = vpop.permute.xlu0 %1476  ;;  %v576_v37 = vpop.xlane.xlu1 %575 }
 0x31e   : > { %v584_v38 = vsub.f32 %v3976_v32, %v576_v37 }
 0x320   : > { %v599_v45 = vmul.f32 1.442695, %v584_v38 }
 0x321   : > { %v3566_v40 = vpop.permute.xlu0 %3565  ;;  %v573_v41 = vpop.xlane.xlu1 %572 }
 0x322   : > { %v3568_v42 = vunpack.i.h.bf16 %v3566_v40  ;;  %v3567_v43 = vunpack.i.l.bf16 %v3566_v40  ;;  %v583_v44 = vsub.f32 %v3978_v33, %v573_v41 }
 0x324   : > { %v3337_v46 = vpack.c.bf16 %v3568_v42, %v3567_v43  ;;  %v597_v47 = vmul.f32 1.442695, %v583_v44 }
 0x325   : > { %v798_v48 = vpop.permute.xlu1 %797 }
 0x326   : > { %3656 = vpow2.f32 %v597_v47  ;;  %3338 = vmatprep.subr.bf16.mxu1 %v3337_v46 }
 0x327   : > { %3658 = vpow2.f32 %v599_v45  ;;  %3340 = vmatpush3.bf16.msra.mxu1 %v3337_v46 }
 0x329   : > { %v802_v49 = vpop.permute.xlu1 %801 }
 0x32d   : > { %v806_v50 = vpop.permute.xlu1 %805 }
 0x330   : > { %v4066_v51 = vpop.eup %3656 }
 0x331   : > { %v4068_v52 = vpop.eup %3658  ;;  %3038 = vmatprep.mubr.msk.f32.mxu0 %vm552_vm3, %v4066_v51  ;;  %v810_v32 = vpop.permute.xlu1 %809 }
 0x332   : > { %3039 = vmatmul.mubr.msk.f32.gmra.mrb[14].mxu0 %vm552_vm3, %v4068_v52 }
 0x333   : > { %3057 = vmatprep.mubr.msk.f32.mxu0 %vm406_vm1, %v796_v1 }
 0x335   : > { %v3551_v33 = vpop.permute.xlu1 %3550 }
 0x336   : > { %v3553_v53 = vunpack.i.h.bf16 %v3551_v33  ;;  %v3552_v54 = vunpack.i.l.bf16 %v3551_v33  ;;  %3058 = vmatmul.mubr.msk.f32.vlgmr.msra.gmra.mrb[16].mxu0 %vm406_vm1, %v798_v48 }
 0x337   : > { %3358 = vmatpush3.bf16.xpose.msk.msra.mxu0 %vm3907_vm2, %v3353_v27  ;;  %3060 = vmatprep.mubr.msk.f32.mxu0 %vm406_vm1, %v800_v4 }
 0x338   : > { %v3359_v55 = vpack.c.bf16 %v3553_v53, %v3552_v54 }
 0x339   : > { %v3561_v56 = vpop.permute.xlu1 %3560 }
 0x33a   : > { %3061 = vmatmul.mubr.msk.f32.gmra.mrb[18].mxu0 %vm406_vm1, %v802_v49  ;;  %3361 = vmatprep.subr.msk.bf16.mxu0 %vm3907_vm2, %v3359_v55  ;;  %v3563_v2 = vunpack.i.h.bf16 %v3561_v56  ;;  %v3562_v3 = vunpack.i.l.bf16 %v3561_v56 }
 0x33b   : > { %3063 = vmatprep.mubr.msk.f32.mxu0 %vm406_vm1, %v804_v9 }
 0x33c   : > { %v3371_v5 = vpack.c.bf16 %v3563_v2, %v3562_v3 }
 0x33d   : > { %v1467_v61 = vpop.permute.xlu1 %1466 }
 0x33e   : > { %3064 = vmatmul.mubr.msk.f32.gmra.mrb[20].mxu0 %vm406_vm1, %v806_v50 }
 0x33f   : > { %3364 = vmatpush3.bf16.xpose.msk.msra.mxu0 %vm3907_vm2, %v3359_v55  ;;  %3066 = vmatprep.mubr.msk.f32.mxu0 %vm406_vm1, %v808_v19 }
 0x340   : > { %3367 = vmatprep.subr.msk.bf16.mxu0 %vm3907_vm2, %v3365_v62 }
 0x341   : > { %v1471_v1 = vpop.permute.xlu1 %1470 }
 0x342   : > { %3067 = vmatmul.mubr.msk.f32.gmra.mrb[22].mxu0 %vm406_vm1, %v810_v32 }
 0x343   : > { %3141 = vmatprep.mubr.msk.f32.mxu0 %vm406_vm1, %v1465_v29 }
 0x345   : > { %v1475_v4 = vpop.permute.xlu1 %1474 }
 0x347   : > { %3370 = vmatpush3.bf16.xpose.msk.msra.mxu0 %vm3907_vm2, %v3365_v62  ;;  %v604_v62 = vsel %vm552_vm3, %v4019_v60, 0.0 }
 0x348   : > { %3373 = vmatprep.subr.msk.bf16.mxu0 %vm3907_vm2, %v3371_v5 }
 0x349   : > { %v1479_v6 = vpop.permute.xlu1 %1478 }
 0x34d   : > { %v3571_v9 = vpop.permute.xlu1 %3570 }
 0x34e   : > { %v3573_v17 = vunpack.i.h.bf16 %v3571_v9  ;;  %v3572_v18 = vunpack.i.l.bf16 %v3571_v9 }
 0x34f   : > { %3376 = vmatpush3.bf16.xpose.msk.msra.mxu0 %vm3907_vm2, %v3371_v5 }
 0x350   : > { %v3341_v19 = vpack.c.bf16 %v3573_v17, %v3572_v18 }
 0x352   : > { %3342 = vmatprep.subr.bf16.mxu1 %v3341_v19 }
 0x353   : > { %3344 = vmatpush3.bf16.msra.mxu1 %v3341_v19 }
 0x356   : > { %3142 = vmatmul.mubr.msk.f32.vlgmr.msra.gmra.mrb[24].mxu0 %vm406_vm1, %v1467_v61 }
 0x357   : > { %3144 = vmatprep.mubr.msk.f32.mxu0 %vm406_vm1, %v4058_v30 }
 0x35a   : > { %3145 = vmatmul.mubr.msk.f32.gmra.mrb[26].mxu0 %vm406_vm1, %v1471_v1 }
 0x35b   : > { %3147 = vmatprep.mubr.msk.f32.mxu0 %vm406_vm1, %v4060_v34 }
 0x35e   : > { %3148 = vmatmul.mubr.msk.f32.gmra.mrb[28].mxu0 %vm406_vm1, %v1475_v4 }
 0x35f   : > { %3150 = vmatprep.mubr.msk.f32.mxu0 %vm406_vm1, %v4062_v36 }
 0x362   : > { %3151 = vmatmul.mubr.msk.f32.gmra.mrb[30].mxu0 %vm406_vm1, %v1479_v6 }
 0x3c9   : > { %v4107_v22 = vpop.f32.mrb[8].mxu0 }
 0x3ca   : > { %v4109_v23 = vpop.f32.mrb[9].mxu0 }
 0x3cd   : > { %v4111_v24 = vpop.f32.mrb[10].mxu0 }
 0x3ce   : > { %v4113_v25 = vpop.f32.mrb[11].mxu0 }
 0x3d5   : > { %v4115_v27 = vpop.f32.mrb[12].mxu0 }
 0x3d6   : > { %v4117_v28 = vpop.f32.mrb[13].mxu0 }
 0x405   : > { %v4119_v29 = vpop.f32.mrb[14].mxu0 }
 0x406   : > { %v4121_v30 = vpop.f32.mrb[15].mxu0 }
 0x409   : > { %v4123_v34 = vpop.f32.mrb[16].mxu0 }
 0x40a   : > { %v4125_v36 = vpop.f32.mrb[17].mxu0  ;;  %v967_v37 = vsel %vm552_vm3, %v4123_v34, -inf }
 0x40b   : > { %968 = vmax.xlane.f32.xlu1 %v967_v37  ;;  %v964_v38 = vsel %vm552_vm3, %v4125_v36, -inf }
 0x40c   : > { %965 = vmax.xlane.f32.xlu0 %v964_v38 }
 0x40d   : > { %v4131_v40 = vpop.f32.mrb[18].mxu0 }
 0x40e   : > { %v4133_v41 = vpop.f32.mrb[19].mxu0  ;;  %v973_v42 = vsel %vm552_vm3, %v4131_v40, -inf }
 0x40f   : > { %v970_v45 = vsel %vm552_vm3, %v4133_v41, -inf }
 0x410   : > { %974 = vmax.xlane.f32.xlu0 %v973_v42 }
 0x411   : > { %v4137_v43 = vpop.f32.mrb[20].mxu0 }
 0x412   : > { %v4139_v44 = vpop.f32.mrb[21].mxu0  ;;  %v979_v50 = vsel %vm552_vm3, %v4137_v43, -inf }
 0x413   : > { %v976_v46 = vsel %vm552_vm3, %v4139_v44, -inf }
 0x414   : > { %971 = vmax.xlane.f32.xlu0 %v970_v45  ;;  %977 = vmax.xlane.f32.xlu1 %v976_v46 }
 0x415   : > { %v4145_v47 = vpop.f32.mrb[22].mxu0 }
 0x416   : > { %v4147_v48 = vpop.f32.mrb[23].mxu0  ;;  %v985_v49 = vsel %vm552_vm3, %v4145_v47, -inf }
 0x417   : > { %v982_v32 = vsel %vm552_vm3, %v4147_v48, -inf }
 0x418   : > { %980 = vmax.xlane.f32.xlu0 %v979_v50  ;;  %986 = vmax.xlane.f32.xlu1 %v985_v49 }
 0x41c   : > { %983 = vmax.xlane.f32.xlu1 %v982_v32 }
 0x429   : > { %v4155_v33 = vpop.f32.mrb[24].mxu0 }
 0x42a   : > { %v4157_v53 = vpop.f32.mrb[25].mxu0 }
 0x42d   : > { %v4159_v54 = vpop.f32.mrb[26].mxu0  ;;  %3580 = vrot.lane.b32.xlu1 %v3895_v35, %s3786_s15 }
 0x42e   : > { %v4163_v55 = vpop.f32.mrb[27].mxu0  ;;  %3575 = vrot.lane.b32.xlu0 %v3885_v31, %s3786_s15  ;;  %v1642_v60 = vsel %vm552_vm3, %v4159_v54, -inf }
 0x431   : > { %v4167_v56 = vpop.f32.mrb[28].mxu0  ;;  %3590 = vrot.lane.b32.xlu1 %v3876_v26, %s3787_s16 }
 0x432   : > { %v4170_v57 = vpop.f32.mrb[29].mxu0  ;;  %3585 = vrot.lane.b32.xlu0 %v3863_v20, %s3787_s16 }
 0x435   : > { %v4173_v59 = vpop.f32.mrb[30].mxu0  ;;  %3600 = vrot.lane.b32.xlu1 %v3895_v35, %s3787_s16 }
 0x436   : > { %v4176_v61 = vpop.f32.mrb[31].mxu0  ;;  %3595 = vrot.lane.b32.xlu0 %v3885_v31, %s3787_s16 }
 0x439   : > { %2014 = vrot.lane.b32.xlu1 %v3935_v10, %s3788_s17  ;;  %v610_v10 = vsel %vm552_vm3, %v4032_v0, 0.0  ;;  %v1648_v0 = vsel %vm552_vm3, %v4167_v56, -inf }
 0x43a   : > { %2012 = vrot.lane.b32.xlu0 %v3865_v21, %s3788_s17  ;;  %v601_v21 = vsel %vm552_vm3, %v4017_v58, 0.0  ;;  %v1633_v58 = vsel %vm552_vm3, %v4157_v53, -inf }
 0x43d   : > { %2018 = vrot.lane.b32.xlu1 %v3945_v12, %s3788_s17  ;;  %v607_v12 = vsel %vm552_vm3, %v4028_v63, 0.0  ;;  %v1639_v63 = vsel %vm552_vm3, %v4163_v55, -inf }
 0x43e   : > { %2016 = vrot.lane.b32.xlu0 %v3938_v11, %s3788_s17  ;;  %v616_v11 = vsel %vm552_vm3, %v4044_v8, 0.0  ;;  %v1651_v8 = vsel %vm552_vm3, %v4176_v61, -inf }
 0x441   : > { %2022 = vrot.lane.b32.xlu1 %v3955_v14, %s3788_s17  ;;  %v613_v14 = vsel %vm552_vm3, %v4040_v7, 0.0  ;;  %v1645_v7 = vsel %vm552_vm3, %v4170_v57, -inf }
 0x442   : > { %2020 = vrot.lane.b32.xlu0 %v3948_v13, %s3788_s17  ;;  %v622_v13 = vsel %vm552_vm3, %v4068_v52, 0.0 }
 0x445   : > { %2026 = vrot.lane.b32.xlu1 %v3965_v16, %s3788_s17  ;;  %v1636_v16 = vsel %vm552_vm3, %v4155_v33, -inf }
 0x446   : > { %2024 = vrot.lane.b32.xlu0 %v3958_v15, %s3788_s17  ;;  %v619_v15 = vsel %vm552_vm3, %v4066_v51, 0.0 }
 0x465   : > { %605 = vadd.xlane.f32.xlu0 %v604_v62 }
 0x469   : > { %611 = vadd.xlane.f32.xlu0 %v610_v10  ;;  %602 = vadd.xlane.f32.xlu1 %v601_v21 }
 0x46d   : > { %617 = vadd.xlane.f32.xlu0 %v616_v11  ;;  %608 = vadd.xlane.f32.xlu1 %v607_v12 }
 0x471   : > { %623 = vadd.xlane.f32.xlu0 %v622_v13  ;;  %614 = vadd.xlane.f32.xlu1 %v613_v14 }
 0x475   : > { %620 = vadd.xlane.f32.xlu1 %v619_v15  ;;  %1637 = vmax.xlane.f32.xlu0 %v1636_v16 }
 0x479   : > { %1634 = vmax.xlane.f32.xlu1 %v1633_v58  ;;  %1643 = vmax.xlane.f32.xlu0 %v1642_v60 }
 0x47d   : > { %1640 = vmax.xlane.f32.xlu1 %v1639_v63  ;;  %1649 = vmax.xlane.f32.xlu0 %v1648_v0 }
 0x481   : > { %1646 = vmax.xlane.f32.xlu1 %v1645_v7 }
 0x485   : > { %1652 = vmax.xlane.f32.xlu1 %v1651_v8 }
 0x498   : > { %v969_v51 = vpop.xlane.xlu1 %968 }
 0x499   : > { %v989_v52 = vsub.f32 %v4123_v34, %v969_v51  ;;  %v966_v1 = vpop.xlane.xlu0 %965 }
 0x49a   : > { %v988_v2 = vsub.f32 %v4125_v36, %v966_v1 }
 0x49b   : > { %v998_v3 = vmul.f32 1.442695, %v989_v52 }
 0x49c   : > { %v996_v4 = vmul.f32 1.442695, %v988_v2 }
 0x49d   : > { %3660 = vpow2.f32 %v998_v3  ;;  %v975_v5 = vpop.xlane.xlu0 %974 }
 0x49e   : > { %3662 = vpow2.f32 %v996_v4  ;;  %v991_v6 = vsub.f32 %v4131_v40, %v975_v5 }
 0x4a0   : > { %v1002_v9 = vmul.f32 1.442695, %v991_v6 }
 0x4a1   : > { %v972_v17 = vpop.xlane.xlu0 %971  ;;  %v978_v18 = vpop.xlane.xlu1 %977 }
 0x4a2   : > { %3664 = vpow2.f32 %v1002_v9  ;;  %v990_v19 = vsub.f32 %v4133_v41, %v972_v17  ;;  %v992_v37 = vsub.f32 %v4139_v44, %v978_v18 }
 0x4a4   : > { %v1000_v38 = vmul.f32 1.442695, %v990_v19  ;;  %v1004_v34 = vmul.f32 1.442695, %v992_v37  ;;  %v1654_v37 = vsel %vm552_vm3, %v4173_v59, -inf }
 0x4a5   : > { %v981_v42 = vpop.xlane.xlu0 %980  ;;  %v987_v45 = vpop.xlane.xlu1 %986 }
 0x4a6   : > { %3666 = vpow2.f32 %v1000_v38  ;;  %v993_v36 = vsub.f32 %v4137_v43, %v981_v42  ;;  %v995_v46 = vsub.f32 %v4145_v47, %v987_v45 }
 0x4a7   : > { %v3661_v49 = vpop.eup %3660  ;;  %3668 = vpow2.f32 %v1004_v34 }
 0x4a8   : > { %v3663_v40 = vpop.eup %3662  ;;  %v1006_v50 = vmul.f32 1.442695, %v993_v36  ;;  %v1015_v32 = vsel %vm552_vm3, %v3661_v49, 0.0  ;;  %v1010_v62 = vmul.f32 1.442695, %v995_v46 }
 0x4a9   : > { %3085 = vmatprep.mubr.msk.f32.mxu1 %vm552_vm3, %v3663_v40  ;;  %v3576_v41 = vpop.permute.xlu0 %3575  ;;  %v984_v44 = vpop.xlane.xlu1 %983  ;;  %1016 = vadd.xlane.f32.xlu1 %v1015_v32  ;;  %v1012_v10 = vsel %vm552_vm3, %v3663_v40, 0.0 }
 0x4aa   : > { %3670 = vpow2.f32 %v1006_v50  ;;  %v3578_v21 = vunpack.i.h.bf16 %v3576_v41  ;;  %v3577_v11 = vunpack.i.l.bf16 %v3576_v41  ;;  %v994_v43 = vsub.f32 %v4147_v48, %v984_v44  ;;  %1013 = vadd.xlane.f32.xlu0 %v1012_v10  ;;  %v1205_v10 = vld [vmem:[%s4502_s3 + $0x8] sm:$0xff] }
 0x4ab   : > { %3672 = vpow2.f32 %v1010_v62 }
 0x4ac   : > { %v3665_v47 = vpop.eup %3664  ;;  %v3345_v12 = vpack.c.bf16 %v3578_v21, %v3577_v11  ;;  %v1008_v13 = vmul.f32 1.442695, %v994_v43 }
 0x4ad   : > { %v3586_v14 = vpop.permute.xlu0 %3585  ;;  %v3581_v15 = vpop.permute.xlu1 %3580  ;;  %v1021_v16 = vsel %vm552_vm3, %v3665_v47, 0.0 }
 0x4ae   : > { %3674 = vpow2.f32 %v1008_v13  ;;  %v3588_v58 = vunpack.i.h.bf16 %v3586_v14  ;;  %v3587_v60 = vunpack.i.l.bf16 %v3586_v14  ;;  %v3583_v63 = vunpack.i.h.bf16 %v3581_v15  ;;  %3346 = vmatprep.subr.bf16.mxu1 %v3345_v12  ;;  %1022 = vadd.xlane.f32.xlu0 %v1021_v16 }
 0x4af   : > { %v3582_v0 = vunpack.i.l.bf16 %v3581_v15  ;;  %3348 = vmatpush3.bf16.msra.mxu1 %v3345_v12 }
 0x4b0   : > { %v3667_v7 = vpop.eup %3666  ;;  %v3393_v8 = vpack.c.bf16 %v3588_v58, %v3587_v60 }
 0x4b1   : > { %v3669_v48 = vpop.eup %3668  ;;  %v3349_v51 = vpack.c.bf16 %v3583_v63, %v3582_v0  ;;  %v3596_v52 = vpop.permute.xlu0 %3595  ;;  %v1018_v2 = vsel %vm552_vm3, %v3667_v7, 0.0 }
 0x4b2   : > { %v3591_v1 = vpop.permute.xlu1 %3590  ;;  %3395 = vmatprep.subr.msk.bf16.mxu0 %vm3907_vm2, %v3393_v8  ;;  %1019 = vadd.xlane.f32.xlu0 %v1018_v2  ;;  %v1024_v5 = vsel %vm552_vm3, %v3669_v48, 0.0  ;;  %v3598_v34 = vunpack.i.h.bf16 %v3596_v52  ;;  %v3597_v42 = vunpack.i.l.bf16 %v3596_v52 }
 0x4b3   : > { %v3593_v3 = vunpack.i.h.bf16 %v3591_v1  ;;  %v3592_v4 = vunpack.i.l.bf16 %v3591_v1  ;;  %3350 = vmatprep.subr.bf16.mxu1 %v3349_v51  ;;  %3398 = vmatpush3.bf16.xpose.msk.msra.mxu0 %vm3907_vm2, %v3393_v8 }
 0x4b4   : > { %v3671_v6 = vpop.eup %3670  ;;  %1025 = vadd.xlane.f32.xlu1 %v1024_v5  ;;  %3352 = vmatpush3.bf16.msra.mxu1 %v3349_v51  ;;  %v3405_v46 = vpack.c.bf16 %v3598_v34, %v3597_v42 }
 0x4b5   : > { %v3399_v9 = vpack.c.bf16 %v3593_v3, %v3592_v4  ;;  %v2013_v17 = vpop.permute.xlu0 %2012  ;;  %v1027_v18 = vsel %vm552_vm3, %v3671_v6, 0.0  ;;  %v3673_v19 = vpop.eup %3672  ;;  %3097 = vmatprep.subr.mxu1 %v1205_v10 }
 0x4b6   : > { %3211 = vmatprep.mubr.msk.f32.mxu0 %vm406_vm1, %v2013_v17  ;;  %1028 = vadd.xlane.f32.xlu0 %v1027_v18  ;;  %v1033_v36 = vsel %vm552_vm3, %v3673_v19, 0.0 }
 0x4b7   : > { %3401 = vmatprep.subr.msk.bf16.mxu0 %vm3907_vm2, %v3399_v9  ;;  %3086 = vmatmul.mubr.msk.f32.vlgmr.msra.gmra.mrb[8].mxu1 %vm552_vm3, %v3661_v49  ;;  %v3601_v49 = vpop.permute.xlu1 %3600 }
 0x4b8   : > { %v3675_v38 = vpop.eup %3674  ;;  %1655 = vmax.xlane.f32.xlu1 %v1654_v37  ;;  %3088 = vmatprep.mubr.msk.f32.mxu1 %vm552_vm3, %v3667_v7  ;;  %v3603_v40 = vunpack.i.h.bf16 %v3601_v49  ;;  %v3602_v50 = vunpack.i.l.bf16 %v3601_v49 }
 0x4b9   : > { %v1030_v45 = vsel %vm552_vm3, %v3675_v38, 0.0  ;;  %v2017_v41 = vpop.permute.xlu0 %2016  ;;  %3098 = vmatpush3.msra.mxu1 %v1205_v10 }
 0x4ba   : > { %1034 = vadd.xlane.f32.xlu0 %v1033_v36  ;;  %v3411_v32 = vpack.c.bf16 %v3603_v40, %v3602_v50 }
 0x4bb   : > { %3089 = vmatmul.mubr.msk.f32.gmra.mrb[10].mxu1 %vm552_vm3, %v3665_v47  ;;  %3404 = vmatpush3.bf16.xpose.msk.msra.mxu0 %vm3907_vm2, %v3399_v9  ;;  %v2015_v62 = vpop.permute.xlu1 %2014  ;;  %v794_v47 = vld [vmem:[%s4502_s3] sm:$0xff] }
 0x4bc   : > { %1031 = vadd.xlane.f32.xlu1 %v1030_v45  ;;  %3091 = vmatprep.mubr.msk.f32.mxu1 %vm552_vm3, %v3669_v48 }
 0x4bd   : > { %3407 = vmatprep.subr.msk.bf16.mxu0 %vm3907_vm2, %v3405_v46  ;;  %v2021_v39 = vpop.permute.xlu0 %2020  ;;  %3111 = vmatprep.subr.mxu1 %v794_v47 }
 0x4bf   : > { %3092 = vmatmul.mubr.msk.f32.gmra.mrb[12].mxu1 %vm552_vm3, %v3671_v6  ;;  %v2019_v44 = vpop.permute.xlu1 %2018 }
 0x4c0   : > { %3094 = vmatprep.mubr.msk.f32.mxu1 %vm552_vm3, %v3675_v38 }
 0x4c1   : > { %v2025_v11 = vpop.permute.xlu0 %2024 }
 0x4c3   : > { %3095 = vmatmul.mubr.msk.f32.gmra.mrb[14].mxu1 %vm552_vm3, %v3673_v19  ;;  %3410 = vmatpush3.bf16.xpose.msk.msra.mxu0 %vm3907_vm2, %v3405_v46  ;;  %v2023_v21 = vpop.permute.xlu1 %2022 }
 0x4c4   : > { %3413 = vmatprep.subr.msk.bf16.mxu0 %vm3907_vm2, %v3411_v32 }
 0x4c7   : > { %v2027_v43 = vpop.permute.xlu1 %2026 }
 0x4cb   : > { %3416 = vmatpush3.bf16.xpose.msk.msra.mxu0 %vm3907_vm2, %v3411_v32 }
 0x4cd   : > { %3610 = vrot.lane.b32.xlu1 %v3876_v26, %s3789_s20 }
 0x4d0   : > { %3605 = vrot.lane.b32.xlu0 %v3863_v20, %s3789_s20 }
 0x4d1   : > { %3620 = vrot.lane.b32.xlu1 %v3895_v35, %s3789_s20 }
 0x4d2   : > { %3212 = vmatmul.mubr.msk.f32.vlgmr.msra.gmra.mrb[32].mxu0 %vm406_vm1, %v2015_v62 }
 0x4d3   : > { %3214 = vmatprep.mubr.msk.f32.mxu0 %vm406_vm1, %v2017_v41 }
 0x4d4   : > { %3615 = vrot.lane.b32.xlu0 %v3885_v31, %s3789_s20 }
 0x4d6   : > { %3215 = vmatmul.mubr.msk.f32.gmra.mrb[34].mxu0 %vm406_vm1, %v2019_v44 }
 0x4d7   : > { %3217 = vmatprep.mubr.msk.f32.mxu0 %vm406_vm1, %v2021_v39 }
 0x4da   : > { %3218 = vmatmul.mubr.msk.f32.gmra.mrb[36].mxu0 %vm406_vm1, %v2023_v21 }
 0x4db   : > { %3220 = vmatprep.mubr.msk.f32.mxu0 %vm406_vm1, %v2025_v11 }
 0x4de   : > { %3221 = vmatmul.mubr.msk.f32.gmra.mrb[38].mxu0 %vm406_vm1, %v2027_v43 }
 0x4f2   : > { %v606_v12 = vpop.xlane.xlu0 %605 }
 0x4f6   : > { %v612_v13 = vpop.xlane.xlu0 %611  ;;  %v603_v14 = vpop.xlane.xlu1 %602 }
 0x4fa   : > { %v4277_v15 = vpop.xlane.xlu0 %617  ;;  %v609_v16 = vpop.xlane.xlu1 %608 }
 0x4fe   : > { %v4279_v58 = vpop.xlane.xlu0 %623  ;;  %v615_v60 = vpop.xlane.xlu1 %614 }
 0x502   : > { %v4281_v63 = vpop.xlane.xlu0 %1637  ;;  %v4283_v0 = vpop.xlane.xlu1 %620 }
 0x506   : > { %v4285_v7 = vpop.xlane.xlu0 %1643  ;;  %v4287_v8 = vpop.xlane.xlu1 %1634 }
 0x50a   : > { %v4289_v48 = vpop.xlane.xlu0 %1649  ;;  %v4291_v51 = vpop.xlane.xlu1 %1640 }
 0x50e   : > { %v4293_v1 = vpop.xlane.xlu1 %1646 }
 0x512   : > { %v4295_v3 = vpop.xlane.xlu1 %1652 }
 0x536   : > { %v1017_v5 = vpop.xlane.xlu1 %1016 }
 0x537   : > { %v1014_v52 = vpop.xlane.xlu0 %1013 }
 0x538   : > { %3676 = vrcp.f32 %v1014_v52 }
 0x539   : > { %3678 = vrcp.f32 %v1017_v5 }
 0x53b   : > { %v1023_v2 = vpop.xlane.xlu0 %1022 }
 0x53f   : > { %v1020_v4 = vpop.xlane.xlu0 %1019 }
 0x540   : > { %3680 = vrcp.f32 %v1020_v4 }
 0x541   : > { %v1026_v9 = vpop.xlane.xlu1 %1025  ;;  %3682 = vrcp.f32 %v1023_v2 }
 0x542   : > { %3684 = vrcp.f32 %v1026_v9  ;;  %v3677_v34 = vpop.eup %3676 }
 0x543   : > { %v1029_v6 = vpop.xlane.xlu0 %1028  ;;  %v3679_v46 = vpop.eup %3678 }
 0x544   : > { %3686 = vrcp.f32 %v1029_v6 }
 0x545   : > { %v4297_v18 = vpop.xlane.xlu1 %1655  ;;  %3688 = vrcp.f32 %v603_v14 }
 0x547   : > { %v1035_v17 = vpop.xlane.xlu0 %1034 }
 0x549   : > { %v1032_v37 = vpop.xlane.xlu1 %1031 }
 0x54a   : > { %3690 = vrcp.f32 %v1032_v37  ;;  %v3681_v32 = vpop.eup %3680 }
 0x54b   : > { %v3606_v19 = vpop.permute.xlu0 %3605  ;;  %3692 = vrcp.f32 %v1035_v17  ;;  %v3683_v44 = vpop.eup %3682 }
 0x54c   : > { %v3608_v42 = vunpack.i.h.bf16 %v3606_v19  ;;  %v3607_v45 = vunpack.i.l.bf16 %v3606_v19  ;;  %3694 = vrcp.f32 %v606_v12  ;;  %v3685_v11 = vpop.eup %3684 }
 0x54d   : > { %3696 = vrcp.f32 %v609_v16  ;;  %v3611_v6 = vpop.permute.xlu1 %3610 }
 0x54e   : > { %v3377_v62 = vpack.c.bf16 %v3608_v42, %v3607_v45  ;;  %v3687_v14 = vpop.eup %3686  ;;  %3698 = vrcp.f32 %v612_v13  ;;  %v1657_v13 = vsub.f32 %v4157_v53, %v4287_v8  ;;  %v1659_v42 = vsub.f32 %v4163_v55, %v4291_v51 }
 0x54f   : > { %3700 = vrcp.f32 %v615_v60  ;;  %v3689_v4 = vpop.eup %3688  ;;  %v1661_v55 = vsub.f32 %v4170_v57, %v4293_v1 }
 0x550   : > { %3702 = vrcp.f32 %v4277_v15  ;;  %v786_v19 = vmul.f32 %v3689_v4, %v4109_v23  ;;  %v1658_v15 = vsub.f32 %v4155_v33, %v4281_v63  ;;  %v1665_v8 = vmul.f32 1.442695, %v1657_v13 }
 0x551   : > { %3704 = vrcp.f32 %v4283_v0  ;;  %v3616_v0 = vpop.permute.xlu0 %3615  ;;  %v1660_v33 = vsub.f32 %v4159_v54, %v4285_v7  ;;  %v3621_v63 = vpop.permute.xlu1 %3620  ;;  %v1662_v7 = vsub.f32 %v4167_v56, %v4289_v48  ;;  %v1673_v57 = vmul.f32 1.442695, %v1661_v55 }
 0x552   : > { %3706 = vrcp.f32 %v4279_v58  ;;  %v1667_v58 = vmul.f32 1.442695, %v1658_v15  ;;  %v1664_v48 = vsub.f32 %v4173_v59, %v4297_v18  ;;  %v1874_v15 = vld [vmem:[%s4502_s3 + $0x10] sm:$0xff] }
 0x553   : > { %3708 = vpow2.f32 %v1665_v8  ;;  %v1671_v54 = vmul.f32 1.442695, %v1660_v33  ;;  %v1675_v56 = vmul.f32 1.442695, %v1662_v7 }
 0x554   : > { %3710 = vpow2.f32 %v1667_v58  ;;  %v1679_v59 = vmul.f32 1.442695, %v1664_v48 }
 0x58a   : > { %v3087_v38 = vpop.f32.mrb[8].mxu1 }
 0x58b   : > { %v1150_v36 = vpop.f32.mrb[9].mxu1  ;;  %v1198_v40 = vmul.f32 %v3679_v46, %v3087_v38  ;;  %v3613_v38 = vunpack.i.h.bf16 %v3611_v6 }
 0x58c   : > { %v1197_v49 = vmul.f32 %v3677_v34, %v1150_v36  ;;  %v3612_v34 = vunpack.i.l.bf16 %v3611_v6 }
 0x58e   : > { %v3090_v50 = vpop.f32.mrb[10].mxu1  ;;  %3099 = vmatprep.mubr.msk.f32.mxu1 %vm406_vm1, %v1197_v49  ;;  %v3381_v46 = vpack.c.bf16 %v3613_v38, %v3612_v34  ;;  %v3618_v49 = vunpack.i.h.bf16 %v3616_v0 }
 0x58f   : > { %v1160_v41 = vpop.f32.mrb[11].mxu1  ;;  %3100 = vmatmul.mubr.msk.f32.vlgmr.msra.gmra.mrb[16].mxu1 %vm406_vm1, %v1198_v40  ;;  %v1200_v39 = vmul.f32 %v3683_v44, %v3090_v50  ;;  %v3617_v40 = vunpack.i.l.bf16 %v3616_v0  ;;  %v3623_v44 = vunpack.i.h.bf16 %v3621_v63 }
 0x590   : > { %v1199_v10 = vmul.f32 %v3681_v32, %v1160_v41  ;;  %3112 = vmatpush3.msra.mxu1 %v794_v47  ;;  %v3691_v47 = vpop.eup %3690 }
 0x591   : > { %3378 = vmatprep.subr.bf16.mxu1 %v3377_v62  ;;  %v3693_v16 = vpop.eup %3692  ;;  %v3385_v41 = vpack.c.bf16 %v3618_v49, %v3617_v40 }
 0x592   : > { %v3093_v21 = vpop.f32.mrb[12].mxu1  ;;  %3102 = vmatprep.mubr.msk.f32.mxu1 %vm406_vm1, %v1199_v10  ;;  %v3695_v17 = vpop.eup %3694  ;;  %v3622_v10 = vunpack.i.l.bf16 %v3621_v63 }
 0x593   : > { %v1170_v43 = vpop.f32.mrb[13].mxu1  ;;  %3103 = vmatmul.mubr.msk.f32.gmra.mrb[18].mxu1 %vm406_vm1, %v1200_v39  ;;  %v1202_v2 = vmul.f32 %v3687_v14, %v3093_v21  ;;  %v3697_v37 = vpop.eup %3696  ;;  %v787_v53 = vmul.f32 %v3695_v17, %v4107_v22  ;;  %v1669_v22 = vmul.f32 1.442695, %v1659_v42 }
 0x594   : > { %v1201_v52 = vmul.f32 %v3685_v11, %v1170_v43  ;;  %v3699_v23 = vpop.eup %3698  ;;  %v788_v45 = vmul.f32 %v3697_v37, %v4113_v25  ;;  %v3389_v39 = vpack.c.bf16 %v3623_v44, %v3622_v10 }
 0x595   : > { %v3701_v36 = vpop.eup %3700  ;;  %v789_v25 = vmul.f32 %v3699_v23, %v4111_v24  ;;  %3712 = vpow2.f32 %v1669_v22  ;;  %v1663_v24 = vsub.f32 %v4176_v61, %v4295_v3 }
 0x596   : > { %v3096_v5 = vpop.f32.mrb[14].mxu1  ;;  %3105 = vmatprep.mubr.msk.f32.mxu1 %vm406_vm1, %v1201_v52  ;;  %v3703_v51 = vpop.eup %3702  ;;  %v790_v50 = vmul.f32 %v3701_v36, %v4117_v28  ;;  %3714 = vpow2.f32 %v1671_v54 }
 0x597   : > { %v1180_v12 = vpop.f32.mrb[15].mxu1  ;;  %3106 = vmatmul.mubr.msk.f32.gmra.mrb[20].mxu1 %vm406_vm1, %v1202_v2  ;;  %v1204_v60 = vmul.f32 %v3693_v16, %v3096_v5  ;;  %v3705_v32 = vpop.eup %3704  ;;  %v791_v28 = vmul.f32 %v3703_v51, %v4115_v27  ;;  %3716 = vpow2.f32 %v1673_v57  ;;  %v1677_v27 = vmul.f32 1.442695, %v1663_v24 }
 0x598   : > { %v1203_v9 = vmul.f32 %v3691_v47, %v1180_v12  ;;  %v3707_v1 = vpop.eup %3706  ;;  %3718 = vpow2.f32 %v1675_v56 }
 0x599   : > { %v793_v61 = vmul.f32 %v3707_v1, %v4119_v29  ;;  %v3709_v3 = vpop.eup %3708  ;;  %3720 = vpow2.f32 %v1677_v27 }
 0x59a   : > { %3108 = vmatprep.mubr.msk.f32.mxu1 %vm406_vm1, %v1203_v9  ;;  %v3711_v52 = vpop.eup %3710  ;;  %3722 = vpow2.f32 %v1679_v59  ;;  %v1681_v0 = vsel %vm552_vm3, %v3709_v3, 0.0 }
 0x59b   : > { %3109 = vmatmul.mubr.msk.f32.gmra.mrb[22].mxu1 %vm406_vm1, %v1204_v60  ;;  %v1684_v8 = vsel %vm552_vm3, %v3711_v52, 0.0 }
 0x59c   : > { %3113 = vmatprep.mubr.msk.f32.mxu1 %vm406_vm1, %v786_v19 }
 0x59f   : > { %3114 = vmatmul.mubr.msk.f32.vlgmr.msra.gmra.mrb[16].mxu1 %vm406_vm1, %v787_v53  ;;  %v3713_v2 = vpop.eup %3712 }
 0x5a0   : > { %3380 = vmatpush3.bf16.msra.mxu1 %v3377_v62  ;;  %3116 = vmatprep.mubr.msk.f32.mxu1 %vm406_vm1, %v788_v45  ;;  %v792_v62 = vmul.f32 %v3705_v32, %v4121_v30  ;;  %v3715_v16 = vpop.eup %3714  ;;  %v1687_v23 = vsel %vm552_vm3, %v3713_v2, 0.0 }
 0x5a1   : > { %3382 = vmatprep.subr.bf16.mxu1 %v3381_v46  ;;  %v3717_v6 = vpop.eup %3716  ;;  %v1690_v53 = vsel %vm552_vm3, %v3715_v16, 0.0 }
 0x5a2   : > { %v3719_v19 = vpop.eup %3718 }
 0x5a3   : > { %3117 = vmatmul.mubr.msk.f32.gmra.mrb[18].mxu1 %vm406_vm1, %v789_v25  ;;  %v3721_v37 = vpop.eup %3720  ;;  %v1696_v42 = vsel %vm552_vm3, %v3719_v19, 0.0 }
 0x5a4   : > { %3384 = vmatpush3.bf16.msra.mxu1 %v3381_v46  ;;  %3119 = vmatprep.mubr.msk.f32.mxu1 %vm406_vm1, %v790_v50  ;;  %v3723_v34 = vpop.eup %3722  ;;  %v1699_v45 = vsel %vm552_vm3, %v3721_v37, 0.0 }
 0x5a5   : > { %3386 = vmatprep.subr.bf16.mxu1 %v3385_v41  ;;  %v4336_v21 = vpop.f32.mrb[32].mxu0 }
 0x5a6   : > { %v4341_v11 = vpop.f32.mrb[33].mxu0  ;;  %v2184_v14 = vsel %vm552_vm3, %v4336_v21, -inf }
 0x5a7   : > { %3120 = vmatmul.mubr.msk.f32.gmra.mrb[20].mxu1 %vm406_vm1, %v791_v28  ;;  %v2181_v30 = vsel %vm552_vm3, %v4341_v11, -inf }
 0x5a8   : > { %3388 = vmatpush3.bf16.msra.mxu1 %v3385_v41  ;;  %3122 = vmatprep.mubr.msk.f32.mxu1 %vm406_vm1, %v792_v62 }
 0x5a9   : > { %3390 = vmatprep.subr.bf16.mxu1 %v3389_v39  ;;  %2182 = vmax.xlane.f32.xlu0 %v2181_v30  ;;  %v4347_v43 = vpop.f32.mrb[34].mxu0 }
 0x5aa   : > { %v4350_v18 = vpop.f32.mrb[35].mxu0  ;;  %v2190_v47 = vsel %vm552_vm3, %v4347_v43, -inf }
 0x5ab   : > { %3123 = vmatmul.mubr.msk.f32.gmra.mrb[22].mxu1 %vm406_vm1, %v793_v61  ;;  %v2187_v29 = vsel %vm552_vm3, %v4350_v18, -inf }
 0x5ac   : > { %3392 = vmatpush3.bf16.msra.mxu1 %v3389_v39  ;;  %3169 = vmatprep.mubr.msk.f32.mxu1 %vm552_vm3, %v3709_v3 }
 0x5ad   : > { %2185 = vmax.xlane.f32.xlu0 %v2184_v14  ;;  %2188 = vmax.xlane.f32.xlu1 %v2187_v29  ;;  %v4357_v4 = vpop.f32.mrb[36].mxu0 }
 0x5ae   : > { %v4360_v5 = vpop.f32.mrb[37].mxu0  ;;  %v2196_v60 = vsel %vm552_vm3, %v4357_v4, -inf  ;;  %3181 = vmatprep.subr.mxu1 %v1874_v15 }
 0x5af   : > { %3170 = vmatmul.mubr.msk.f32.vlgmr.msra.gmra.mrb[24].mxu1 %vm552_vm3, %v3711_v52  ;;  %v2193_v12 = vsel %vm552_vm3, %v4360_v5, -inf }
 0x5b0   : > { %3172 = vmatprep.mubr.msk.f32.mxu1 %vm552_vm3, %v3713_v2  ;;  %3182 = vmatpush3.msra.mxu1 %v1874_v15 }
 0x5b1   : > { %2191 = vmax.xlane.f32.xlu0 %v2190_v47  ;;  %2194 = vmax.xlane.f32.xlu1 %v2193_v12  ;;  %v4367_v9 = vpop.f32.mrb[38].mxu0 }
 0x5b2   : > { %v4370_v13 = vpop.f32.mrb[39].mxu0  ;;  %v2202_v38 = vsel %vm552_vm3, %v4367_v9, -inf }
 0x5b3   : > { %3173 = vmatmul.mubr.msk.f32.gmra.mrb[26].mxu1 %vm552_vm3, %v3715_v16  ;;  %v2199_v17 = vsel %vm552_vm3, %v4370_v13, -inf }
 0x5b4   : > { %3175 = vmatprep.mubr.msk.f32.mxu1 %vm552_vm3, %v3717_v6 }
 0x5b5   : > { %2197 = vmax.xlane.f32.xlu0 %v2196_v60  ;;  %2200 = vmax.xlane.f32.xlu1 %v2199_v17 }
 0x5b7   : > { %3176 = vmatmul.mubr.msk.f32.gmra.mrb[28].mxu1 %vm552_vm3, %v3719_v19 }
 0x5b8   : > { %3178 = vmatprep.mubr.msk.f32.mxu1 %vm552_vm3, %v3721_v37 }
 0x5b9   : > { %2203 = vmax.xlane.f32.xlu1 %v2202_v38 }
 0x5bb   : > { %3179 = vmatmul.mubr.msk.f32.gmra.mrb[30].mxu1 %vm552_vm3, %v3723_v34 }
 0x5ca   : > { %3630 = vrot.lane.b32.xlu1 %v3876_v26, %s3790_s27  ;;  %v1693_v26 = vsel %vm552_vm3, %v3717_v6, 0.0 }
 0x5cb   : > { %3625 = vrot.lane.b32.xlu0 %v3863_v20, %s3790_s27  ;;  %v1702_v20 = vsel %vm552_vm3, %v3723_v34, 0.0 }
 0x5ea   : > { %1682 = vadd.xlane.f32.xlu0 %v1681_v0 }
 0x5ee   : > { %1691 = vadd.xlane.f32.xlu0 %v1690_v53  ;;  %1685 = vadd.xlane.f32.xlu1 %v1684_v8 }
 0x5f2   : > { %1697 = vadd.xlane.f32.xlu0 %v1696_v42  ;;  %1688 = vadd.xlane.f32.xlu1 %v1687_v23 }
 0x5f6   : > { %1694 = vadd.xlane.f32.xlu1 %v1693_v26  ;;  %1703 = vadd.xlane.f32.xlu0 %v1702_v20 }
 0x5fa   : > { %1700 = vadd.xlane.f32.xlu1 %v1699_v45 }
 0x60b   : > { %3640 = vrot.lane.b32.xlu1 %v3895_v35, %s3790_s27 }
 0x60c   : > { %3635 = vrot.lane.b32.xlu0 %v3885_v31, %s3790_s27 }
 0x636   : > { %v2183_v36 = vpop.xlane.xlu0 %2182 }
 0x637   : > { %v2205_v46 = vsub.f32 %v4341_v11, %v2183_v36 }
 0x639   : > { %v2213_v49 = vmul.f32 1.442695, %v2205_v46 }
 0x63a   : > { %v2186_v40 = vpop.xlane.xlu0 %2185  ;;  %v2189_v58 = vpop.xlane.xlu1 %2188 }
 0x63b   : > { %3724 = vpow2.f32 %v2213_v49  ;;  %v2206_v33 = vsub.f32 %v4336_v21, %v2186_v40  ;;  %v2207_v63 = vsub.f32 %v4350_v18, %v2189_v58 }
 0x63d   : > { %v2215_v22 = vmul.f32 1.442695, %v2206_v33  ;;  %v2217_v55 = vmul.f32 1.442695, %v2207_v63 }
 0x63e   : > { %v2192_v25 = vpop.xlane.xlu0 %2191  ;;  %v2195_v51 = vpop.xlane.xlu1 %2194 }
 0x63f   : > { %3726 = vpow2.f32 %v2215_v22  ;;  %v2208_v35 = vsub.f32 %v4347_v43, %v2192_v25  ;;  %v2209_v31 = vsub.f32 %v4360_v5, %v2195_v51 }
 0x640   : > { %3728 = vpow2.f32 %v2217_v55 }
 0x641   : > { %v2219_v50 = vmul.f32 1.442695, %v2208_v35  ;;  %v2221_v32 = vmul.f32 1.442695, %v2209_v31 }
 0x642   : > { %v2198_v41 = vpop.xlane.xlu0 %2197  ;;  %v2201_v44 = vpop.xlane.xlu1 %2200 }
 0x643   : > { %3730 = vpow2.f32 %v2219_v50  ;;  %v2210_v10 = vsub.f32 %v4357_v4, %v2198_v41  ;;  %v2211_v54 = vsub.f32 %v4370_v13, %v2201_v44 }
 0x644   : > { %3732 = vpow2.f32 %v2221_v32 }
 0x645   : > { %v3725_v7 = vpop.eup %3724  ;;  %v2223_v57 = vmul.f32 1.442695, %v2210_v10  ;;  %v2225_v24 = vmul.f32 1.442695, %v2211_v54 }
 0x646   : > { %3239 = vmatprep.mubr.msk.f32.mxu0 %vm552_vm3, %v3725_v7  ;;  %v3626_v28 = vpop.permute.xlu0 %3625  ;;  %v2204_v1 = vpop.xlane.xlu1 %2203  ;;  %v2229_v62 = vsel %vm552_vm3, %v3725_v7, 0.0 }
 0x647   : > { %3734 = vpow2.f32 %v2223_v57  ;;  %v3628_v39 = vunpack.i.h.bf16 %v3626_v28  ;;  %v3627_v21 = vunpack.i.l.bf16 %v3626_v28  ;;  %v2212_v56 = vsub.f32 %v4367_v9, %v2204_v1  ;;  %2230 = vadd.xlane.f32.xlu0 %v2229_v62  ;;  %v2422_v62 = vld [vmem:[%s4502_s3 + $0x18] sm:$0xff] }
 0x648   : > { %3736 = vpow2.f32 %v2225_v24 }
 0x649   : > { %v4407_v48 = vpop.eup %3726  ;;  %v4409_v11 = vpack.c.bf16 %v3628_v39, %v3627_v21  ;;  %v2227_v27 = vmul.f32 1.442695, %v2212_v56 }
 0x64a   : > { %v4411_v30 = vpop.eup %3728  ;;  %v3631_v61 = vpop.permute.xlu1 %3630  ;;  %v2232_v3 = vsel %vm552_vm3, %v4407_v48, 0.0 }
 0x64b   : > { %3738 = vpow2.f32 %v2227_v27  ;;  %v3633_v43 = vunpack.i.h.bf16 %v3631_v61  ;;  %v3632_v59 = vunpack.i.l.bf16 %v3631_v61  ;;  %3418 = vmatprep.subr.bf16.mxu0 %v4409_v11  ;;  %2233 = vadd.xlane.f32.xlu1 %v2232_v3  ;;  %v2235_v18 = vsel %vm552_vm3, %v4411_v30, 0.0 }
 0x64c   : > { %2236 = vadd.xlane.f32.xlu0 %v2235_v18  ;;  %3433 = vmatprep.subr.bf16.mxu1 %v4409_v11 }
 0x64d   : > { %v4419_v14 = vpop.eup %3730  ;;  %v4421_v29 = vpack.c.bf16 %v3633_v43, %v3632_v59  ;;  %3420 = vmatpush3.bf16.msra.mxu0 %v4409_v11 }
 0x64e   : > { %v4424_v52 = vpop.eup %3732  ;;  %v2238_v2 = vsel %vm552_vm3, %v4419_v14, 0.0 }
 0x64f   : > { %v2241_v4 = vsel %vm552_vm3, %v4424_v52, 0.0  ;;  %3422 = vmatprep.subr.bf16.mxu0 %v4421_v29 }
 0x650   : > { %2239 = vadd.xlane.f32.xlu0 %v2238_v2  ;;  %2242 = vadd.xlane.f32.xlu1 %v2241_v4 }
 0x651   : > { %v4431_v5 = vpop.eup %3734  ;;  %3424 = vmatpush3.bf16.msra.mxu0 %v4421_v29 }
 0x652   : > { %v4434_v47 = vpop.eup %3736  ;;  %v2244_v12 = vsel %vm552_vm3, %v4431_v5, 0.0 }
 0x653   : > { %v2247_v16 = vsel %vm552_vm3, %v4434_v47, 0.0 }
 0x654   : > { %2245 = vadd.xlane.f32.xlu0 %v2244_v12  ;;  %2248 = vadd.xlane.f32.xlu1 %v2247_v16 }
 0x655   : > { %v4440_v6 = vpop.eup %3738 }
 0x656   : > { %v2250_v9 = vsel %vm552_vm3, %v4440_v6, 0.0 }
 0x658   : > { %2251 = vadd.xlane.f32.xlu0 %v2250_v9 }
 0x677   : > { %v1683_v13 = vpop.xlane.xlu0 %1682 }
 0x678   : > { %3740 = vrcp.f32 %v1683_v13 }
 0x67b   : > { %v1692_v60 = vpop.xlane.xlu0 %1691  ;;  %v1686_v17 = vpop.xlane.xlu1 %1685 }
 0x67c   : > { %3742 = vrcp.f32 %v1686_v17 }
 0x67d   : > { %3744 = vrcp.f32 %v1692_v60 }
 0x67f   : > { %v1698_v19 = vpop.xlane.xlu0 %1697  ;;  %v1689_v37 = vpop.xlane.xlu1 %1688 }
 0x680   : > { %3746 = vrcp.f32 %v1689_v37 }
 0x681   : > { %3748 = vrcp.f32 %v1698_v19 }
 0x682   : > { %v3171_v38 = vpop.f32.mrb[24].mxu1  ;;  %v3741_v34 = vpop.eup %3740 }
 0x683   : > { %v1819_v15 = vpop.f32.mrb[25].mxu1  ;;  %v1704_v0 = vpop.xlane.xlu0 %1703 }
 0x684   : > { %v1695_v53 = vpop.xlane.xlu1 %1694  ;;  %v1866_v8 = vmul.f32 %v3741_v34, %v1819_v15 }
 0x685   : > { %3750 = vrcp.f32 %v1695_v53  ;;  %v2784_v53 = vld [vmem:[%s4503_s4] ss:$0 sm:$0xff] }
 0x686   : > { %v3174_v42 = vpop.f32.mrb[26].mxu1  ;;  %3183 = vmatprep.mubr.msk.f32.mxu1 %vm406_vm1, %v1866_v8  ;;  %v3743_v26 = vpop.eup %3742 }
 0x687   : > { %v1829_v23 = vpop.f32.mrb[27].mxu1  ;;  %v3636_v20 = vpop.permute.xlu0 %3635  ;;  %v1867_v36 = vmul.f32 %v3743_v26, %v3171_v38 }
 0x688   : > { %v1701_v45 = vpop.xlane.xlu1 %1700  ;;  %v3638_v46 = vunpack.i.h.bf16 %v3636_v20  ;;  %v3637_v49 = vunpack.i.l.bf16 %v3636_v20  ;;  %v3745_v58 = vpop.eup %3744 }
 0x689   : > { %3752 = vrcp.f32 %v1701_v45  ;;  %3184 = vmatmul.mubr.msk.f32.vlgmr.msra.gmra.mrb[16].mxu1 %vm406_vm1, %v1867_v36  ;;  %v1869_v32 = vmul.f32 %v3745_v58, %v3174_v42 }
 0x68a   : > { %3754 = vrcp.f32 %v1704_v0  ;;  %v3177_v40 = vpop.f32.mrb[28].mxu1  ;;  %v3425_v33 = vpack.c.bf16 %v3638_v46, %v3637_v49  ;;  %v3747_v22 = vpop.eup %3746  ;;  %3437 = vmatpush3.bf16.msra.mxu1 %v4409_v11 }
 0x68b   : > { %v1839_v63 = vpop.f32.mrb[29].mxu1  ;;  %v1868_v25 = vmul.f32 %v3747_v22, %v1829_v23  ;;  %3434 = vmatprep.subr.bf16.mxu1 %v4421_v29  ;;  %v3749_v50 = vpop.eup %3748 }
 0x68c   : > { %v3641_v55 = vpop.permute.xlu1 %3640  ;;  %3426 = vmatprep.subr.bf16.mxu0 %v3425_v33  ;;  %v1871_v57 = vmul.f32 %v3749_v50, %v3177_v40 }
 0x68d   : > { %v3643_v51 = vunpack.i.h.bf16 %v3641_v55  ;;  %v3642_v35 = vunpack.i.l.bf16 %v3641_v55  ;;  %3428 = vmatpush3.bf16.msra.mxu0 %v3425_v33  ;;  %3186 = vmatprep.mubr.msk.f32.mxu1 %vm406_vm1, %v1868_v25 }
 0x68e   : > { %v3180_v31 = vpop.f32.mrb[30].mxu1  ;;  %3438 = vmatpush3.bf16.msra.mxu1 %v4421_v29 }
 0x68f   : > { %v3429_v41 = vpack.c.bf16 %v3643_v51, %v3642_v35  ;;  %v1849_v44 = vpop.f32.mrb[31].mxu1  ;;  %v3751_v10 = vpop.eup %3750  ;;  %3187 = vmatmul.mubr.msk.f32.gmra.mrb[18].mxu1 %vm406_vm1, %v1869_v32  ;;  %3435 = vmatprep.subr.bf16.mxu1 %v3425_v33 }
 0x690   : > { %v1870_v54 = vmul.f32 %v3751_v10, %v1839_v63 }
 0x691   : > { %3430 = vmatprep.subr.bf16.mxu0 %v3429_v41 }
 0x692   : > { %3189 = vmatprep.mubr.msk.f32.mxu1 %vm406_vm1, %v1870_v54  ;;  %3432 = vmatpush3.bf16.msra.mxu0 %v3429_v41 }
 0x693   : > { %v3753_v7 = vpop.eup %3752  ;;  %3439 = vmatpush3.bf16.msra.mxu1 %v3425_v33 }
 0x694   : > { %v3755_v24 = vpop.eup %3754  ;;  %v1872_v28 = vmul.f32 %v3753_v7, %v1849_v44  ;;  %3190 = vmatmul.mubr.msk.f32.gmra.mrb[20].mxu1 %vm406_vm1, %v1871_v57  ;;  %3436 = vmatprep.subr.bf16.mxu1 %v3429_v41 }
 0x695   : > { %3240 = vmatmul.mubr.msk.f32.vlgmr.msra.gmra.mrb[40].mxu0 %vm552_vm3, %v4407_v48  ;;  %v1873_v1 = vmul.f32 %v3755_v24, %v3180_v31 }
 0x696   : > { %3192 = vmatprep.mubr.msk.f32.mxu1 %vm406_vm1, %v1872_v28  ;;  %3242 = vmatprep.mubr.msk.f32.mxu0 %vm552_vm3, %v4411_v30 }
 0x697   : > { %3440 = vmatpush3.bf16.msra.mxu1 %v3429_v41 }
 0x698   : > { %3193 = vmatmul.mubr.msk.f32.gmra.mrb[22].mxu1 %vm406_vm1, %v1873_v1  ;;  %3251 = vmatprep.subr.mxu1 %v2422_v62 }
 0x699   : > { %3248 = vmatprep.mubr.msk.f32.mxu1 %vm552_vm3, %v4434_v47  ;;  %3243 = vmatmul.mubr.msk.f32.gmra.mrb[42].mxu0 %vm552_vm3, %v4419_v14 }
 0x69a   : > { %3245 = vmatprep.mubr.msk.f32.mxu0 %vm552_vm3, %v4424_v52 }
 0x69c   : > { %3249 = vmatmul.mubr.msk.f32.vlgmr.msra.gmra.mrb[32].mxu1 %vm552_vm3, %v4440_v6 }
 0x69d   : > { %3246 = vmatmul.mubr.msk.f32.gmra.mrb[44].mxu0 %vm552_vm3, %v4431_v5  ;;  %3252 = vmatpush3.msra.mxu1 %v2422_v62 }
 0x6d4   : > { %v2231_v39 = vpop.xlane.xlu0 %2230 }
 0x6d5   : > { %3756 = vrcp.f32 %v2231_v39 }
 0x6d8   : > { %v2234_v56 = vpop.xlane.xlu1 %2233 }
 0x6d9   : > { %v2237_v21 = vpop.xlane.xlu0 %2236  ;;  %3758 = vrcp.f32 %v2234_v56 }
 0x6da   : > { %3760 = vrcp.f32 %v2237_v21 }
 0x6dd   : > { %v2240_v48 = vpop.xlane.xlu0 %2239  ;;  %v2243_v11 = vpop.xlane.xlu1 %2242 }
 0x6de   : > { %3762 = vrcp.f32 %v2240_v48 }
 0x6df   : > { %3764 = vrcp.f32 %v2243_v11  ;;  %v3757_v3 = vpop.eup %3756 }
 0x6e1   : > { %v2246_v27 = vpop.xlane.xlu0 %2245  ;;  %v2249_v30 = vpop.xlane.xlu1 %2248 }
 0x6e2   : > { %3766 = vrcp.f32 %v2246_v27 }
 0x6e3   : > { %3768 = vrcp.f32 %v2249_v30  ;;  %v3759_v18 = vpop.eup %3758 }
 0x6e4   : > { %v3761_v2 = vpop.eup %3760 }
 0x6e5   : > { %v2252_v43 = vpop.xlane.xlu0 %2251 }
 0x6e6   : > { %3770 = vrcp.f32 %v2252_v43 }
 0x6e8   : > { %v3763_v5 = vpop.eup %3762 }
 0x6e9   : > { %v3765_v13 = vpop.eup %3764 }
 0x6ec   : > { %v3767_v17 = vpop.eup %3766 }
 0x6ed   : > { %v3769_v37 = vpop.eup %3768 }
 0x6f0   : > { %v3771_v15 = vpop.eup %3770 }
 0x768   : > { %v3241_v61 = vpop.f32.mrb[40].mxu0 }
 0x769   : > { %v2367_v59 = vpop.f32.mrb[41].mxu0  ;;  %v2415_v29 = vmul.f32 %v3759_v18, %v3241_v61 }
 0x76a   : > { %v2414_v14 = vmul.f32 %v3757_v3, %v2367_v59 }
 0x76c   : > { %v3244_v52 = vpop.f32.mrb[42].mxu0  ;;  %3253 = vmatprep.mubr.msk.f32.mxu1 %vm406_vm1, %v2414_v14 }
 0x76d   : > { %v2377_v4 = vpop.f32.mrb[43].mxu0  ;;  %3254 = vmatmul.mubr.msk.f32.vlgmr.msra.gmra.mrb[16].mxu1 %vm406_vm1, %v2415_v29  ;;  %v2417_v12 = vmul.f32 %v3763_v5, %v3244_v52 }
 0x76e   : > { %v2416_v47 = vmul.f32 %v3761_v2, %v2377_v4 }
 0x76f   : > { %v3250_v16 = vpop.f32.mrb[32].mxu1 }
 0x770   : > { %v2397_v6 = vpop.f32.mrb[33].mxu1  ;;  %v3247_v9 = vpop.f32.mrb[44].mxu0  ;;  %3256 = vmatprep.mubr.msk.f32.mxu1 %vm406_vm1, %v2416_v47  ;;  %v2421_v0 = vmul.f32 %v3771_v15, %v3250_v16 }
 0x771   : > { %v2387_v60 = vpop.f32.mrb[45].mxu0  ;;  %3257 = vmatmul.mubr.msk.f32.gmra.mrb[18].mxu1 %vm406_vm1, %v2417_v12  ;;  %v2419_v38 = vmul.f32 %v3767_v17, %v3247_v9  ;;  %v2420_v34 = vmul.f32 %v3769_v37, %v2397_v6 }
 0x772   : > { %v2418_v19 = vmul.f32 %v3765_v13, %v2387_v60 }
 0x774   : > { %3259 = vmatprep.mubr.msk.f32.mxu1 %vm406_vm1, %v2418_v19 }
 0x775   : > { %3260 = vmatmul.mubr.msk.f32.gmra.mrb[20].mxu1 %vm406_vm1, %v2419_v38 }
 0x776   : > { %3262 = vmatprep.mubr.msk.f32.mxu1 %vm406_vm1, %v2420_v34 }
 0x779   : > { %3263 = vmatmul.mubr.msk.f32.gmra.mrb[22].mxu1 %vm406_vm1, %v2421_v0 }
 0x840   : > { %v3255_v8 = vpop.f32.mrb[16].mxu1 }
 0x841   : > { %v2568_v42 = vadd.f32 %v3255_v8, %v2784_v53  ;;  %v2513_v23 = vpop.f32.mrb[17].mxu1 }
 0x842   : > { %v2567_v26 = vadd.f32 %v2784_v53, %v2513_v23 }
 0x843   : > { %2576 = vst.msk [vmem:[%s224_s10 + $0x8] sm:$0xff] %vm244_vm0, %v2568_v42 }
 0x844   : > { %2575 = vst.msk [vmem:[%s224_s10] sm:$0xff] %vm244_vm0, %v2567_v26  ;;  %v3258_v20 = vpop.f32.mrb[18].mxu1 }
 0x845   : > { %v2570_v45 = vadd.f32 %v3258_v20, %v2784_v53  ;;  %v2523_v36 = vpop.f32.mrb[19].mxu1 }
 0x846   : > { %v2569_v46 = vadd.f32 %v2784_v53, %v2523_v36 }
 0x847   : > { %2578 = vst.msk [vmem:[%s224_s10 + $0x18] sm:$0xff] %vm244_vm0, %v2570_v45 }
 0x848   : > { %2577 = vst.msk [vmem:[%s224_s10 + $0x10] sm:$0xff] %vm244_vm0, %v2569_v46  ;;  %v3261_v49 = vpop.f32.mrb[20].mxu1 }
 0x849   : > { %v2572_v40 = vadd.f32 %v3261_v49, %v2784_v53  ;;  %v2533_v58 = vpop.f32.mrb[21].mxu1 }
 0x84a   : > { %v2571_v33 = vadd.f32 %v2784_v53, %v2533_v58 }
 0x84b   : > { %2580 = vst.msk [vmem:[%s224_s10 + $0x28] sm:$0xff] %vm244_vm0, %v2572_v40 }
 0x84c   : > { %2579 = vst.msk [vmem:[%s224_s10 + $0x20] sm:$0xff] %vm244_vm0, %v2571_v33  ;;  %v3264_v63 = vpop.f32.mrb[22].mxu1 }
 0x84d   : > { %v2574_v22 = vadd.f32 %v3264_v63, %v2784_v53  ;;  %v2543_v55 = vpop.f32.mrb[23].mxu1 }
 0x84e   : > { %v2573_v25 = vadd.f32 %v2784_v53, %v2543_v55 }
 0x84f   : > { %2582 = vst.msk [vmem:[%s224_s10 + $0x38] sm:$0xff] %vm244_vm0, %v2574_v22 }
 0x850   : > { %2581 = vst.msk [vmem:[%s224_s10 + $0x30] sm:$0xff] %vm244_vm0, %v2573_v25 }
 0x851 PF: > { %s15_s18 = sadd.s32 1, %s3778_s18  }
 0x852   : > { %p12_p4 = scmp.ge.s32.totalorder %s15_s18, 4  }
 0x854   :  { %14 = sbr.rel (!%p12_p4) target bundleno = 1 (0x1), region = 70 }

</bundles_post_ra>
